<compile_context>
chip_gen: v6e
topology: v6e:2x2x1
jax: 0.10.0
libtpu: 0.0.40
codegen_flags: <defaults>
</compile_context>

<pallas_src>
import functools

import jax
import jax.numpy as jnp
from jax import lax
from jax.experimental import pallas as pl
from jax.experimental.pallas import tpu as pltpu


# -----------------------------------------------------------------------------
# Pallas kernel: one time-chunk of BOTH directions of a bidirectional GRU layer.
# grid = (num_chunks,), axis "arbitrary"; hidden state carried across chunks in
# a persistent VMEM scratch.
# -----------------------------------------------------------------------------
def _bigru_chunk_kernel(gi_f_ref, gi_b_ref, mf_ref, mb_ref, whh_ref, bhn_ref,
                        out_f_ref, out_b_ref, hlast_ref, h_sc):
    # gi_f_ref : (Tc, B, 3H) bf16  input projections, forward dir,  chunk c
    # gi_b_ref : (Tc, B, 3H) bf16  input projections, backward dir, chunk nC-1-c
    # mf_ref   : (Tc, B, 1)  f32   valid-step mask, chunk c
    # mb_ref   : (Tc, B, 1)  f32   valid-step mask, chunk nC-1-c
    # whh_ref  : (2, H, 3H)  bf16  recurrent weights, gates [r,z,n] fused
    # bhn_ref  : (2, 1, H)   f32   recurrent bias of n gate (stays under r*)
    # out_f_ref: (Tc, B, H)  f32   per-step outputs, forward dir
    # out_b_ref: (Tc, B, H)  f32   per-step outputs, backward dir
    # hlast_ref: (2, B, H)   f32   final hidden state per direction
    # h_sc     : (2, B, H)   f32   persistent hidden-state carry (VMEM scratch)
    c = pl.program_id(0)
    Tc, B, H = out_f_ref.shape

    @pl.when(c == 0)
    def _():
        h_sc[...] = jnp.zeros_like(h_sc)

    w_f = whh_ref[0]           # (H, 3H) bf16
    w_b = whh_ref[1]
    bhn_f = bhn_ref[0]         # (1, H)  f32
    bhn_b = bhn_ref[1]

    h_f = h_sc[0]              # (B, H)  f32
    h_b = h_sc[1]

    # Static Python loop -> static time indices (no per-step dynamic slicing).
    for t in range(Tc):
        tb = Tc - 1 - t        # backward dir walks its (reverse-ordered) chunk
                               # from the end -> global time Tp-1 - (c*Tc + t)
        gi_f = gi_f_ref[t].astype(jnp.float32)     # (B, 3H)
        gi_b = gi_b_ref[tb].astype(jnp.float32)
        m_f = mf_ref[t]                            # (B, 1)
        m_b = mb_ref[tb]

        # Two independent chains interleaved: both MXU matmuls issue
        # back-to-back so each hides the other's MXU/EUP latency (single-TC).
        gh_f = jnp.dot(h_f.astype(jnp.bfloat16), w_f,
                       preferred_element_type=jnp.float32)
        gh_b = jnp.dot(h_b.astype(jnp.bfloat16), w_b,
                       preferred_element_type=jnp.float32)

        r_f = jax.nn.sigmoid(gi_f[:, :H] + gh_f[:, :H])
        r_b = jax.nn.sigmoid(gi_b[:, :H] + gh_b[:, :H])
        z_f = jax.nn.sigmoid(gi_f[:, H:2 * H] + gh_f[:, H:2 * H])
        z_b = jax.nn.sigmoid(gi_b[:, H:2 * H] + gh_b[:, H:2 * H])
        n_f = jnp.tanh(gi_f[:, 2 * H:] + r_f * (gh_f[:, 2 * H:] + bhn_f))
        n_b = jnp.tanh(gi_b[:, 2 * H:] + r_b * (gh_b[:, 2 * H:] + bhn_b))

        cand_f = (1.0 - z_f) * n_f + z_f * h_f
        cand_b = (1.0 - z_b) * n_b + z_b * h_b

        # packed-sequence semantics: padded step carries h, emits zeros.
        o_f = m_f * cand_f
        o_b = m_b * cand_b
        h_f = o_f + (1.0 - m_f) * h_f
        h_b = o_b + (1.0 - m_b) * h_b

        out_f_ref[t] = o_f.astype(out_f_ref.dtype)
        out_b_ref[tb] = o_b.astype(out_b_ref.dtype)

    h_sc[0] = h_f
    h_sc[1] = h_b
    # Write every chunk (cheap); final chunk's value is the one that lands.
    hlast_ref[0] = h_f.astype(hlast_ref.dtype)
    hlast_ref[1] = h_b.astype(hlast_ref.dtype)


def bigru_layer(gi, mask, w_hh, b_hn, *, time_chunk):
    """Both directions of one GRU layer via the time-chunked Pallas recurrence.

    gi   : (2, Tp, B, 3H) bf16   precomputed input projections (biases folded)
    mask : (Tp, B, 1) f32
    w_hh : (2, H, 3H) bf16
    b_hn : (2, 1, H) f32
    returns out_f (Tp,B,H) f32, out_b (Tp,B,H) f32, h_last (2,B,H) f32
    """
    _, Tp, B, G = gi.shape
    H = G // 3
    Tc = time_chunk
    nC = Tp // Tc

    out_f, out_b, h_last = pl.pallas_call(
        _bigru_chunk_kernel,
        out_shape=(jax.ShapeDtypeStruct((Tp, B, H), jnp.float32),
                   jax.ShapeDtypeStruct((Tp, B, H), jnp.float32),
                   jax.ShapeDtypeStruct((2, B, H), jnp.float32)),
        grid_spec=pltpu.PrefetchScalarGridSpec(
            num_scalar_prefetch=0,
            grid=(nC,),                                   # time chunks (serial)
            in_specs=[
                # forward direction: chunks walk time forwards
                pl.BlockSpec((None, Tc, B, G), lambda c: (0, c, 0, 0)),
                # backward direction: chunks walk time in reverse
                pl.BlockSpec((None, Tc, B, G), lambda c: (1, nC - 1 - c, 0, 0)),
                pl.BlockSpec((Tc, B, 1), lambda c: (c, 0, 0)),
                pl.BlockSpec((Tc, B, 1), lambda c: (nC - 1 - c, 0, 0)),
                pl.BlockSpec((2, H, G), lambda c: (0, 0, 0)),
                pl.BlockSpec((2, 1, H), lambda c: (0, 0, 0)),
            ],
            out_specs=[
                pl.BlockSpec((Tc, B, H), lambda c: (c, 0, 0)),
                pl.BlockSpec((Tc, B, H), lambda c: (nC - 1 - c, 0, 0)),
                pl.BlockSpec((2, B, H), lambda c: (0, 0, 0)),
            ],
            scratch_shapes=[pltpu.VMEM((2, B, H), jnp.float32)],  # h carry
        ),
        compiler_params=pltpu.CompilerParams(
            dimension_semantics=("arbitrary",),           # h carried serially
            vmem_limit_bytes=64 * 1024 * 1024,
        ),
    )(gi, gi, mask, mask, w_hh, b_hn)   # gi/mask passed twice: fwd & reversed windows
    return out_f, out_b, h_last


# -----------------------------------------------------------------------------
# EncoderRNN.forward
# -----------------------------------------------------------------------------
def encoder_rnn_forward(input_seqs, input_lengths, params, n_layers,
                        time_chunk=4):
    """input_seqs: (T, B) int32, input_lengths: (B,) int32 (sorted descending)."""
    emb = jnp.take(params["embedding"], input_seqs, axis=0)   # (T, B, H) f32
    T, B, H = emb.shape

    # Pad T to the time-chunk and B to the f32 sublane count (8). Padded
    # rows/steps carry mask = 0 -> they keep h and emit zeros (inert).
    Tp = -(-T // time_chunk) * time_chunk
    Bp = -(-B // 8) * 8
    emb = jnp.pad(emb, ((0, Tp - T), (0, Bp - B), (0, 0)))
    lengths_p = jnp.pad(input_lengths, (0, Bp - B))
    mask = (jnp.arange(Tp)[:, None] < lengths_p[None, :]).astype(jnp.float32)
    mask = mask[..., None]                                    # (Tp, Bp, 1)

    hiddens = []
    out_f = out_b = None
    for l in range(n_layers):
        w_ih, b_ih, w_hh, b_hh = params[f"l{l}"]
        # Fold r/z recurrent biases into the precomputed gates; only b_hh[n]
        # must stay inside the kernel (it sits under the r* factor).
        b_gi = b_ih.at[:, :2 * H].add(b_hh[:, :2 * H])        # (2, 3H)
        b_hn = b_hh[:, 2 * H:].reshape(2, 1, H)               # (2, 1, H)

        # Time-parallel input projection, default MXU precision (not HIGHEST).
        if l == 0:
            gi = jnp.einsum("tbi,dig->dtbg", emb, w_ih)
        else:
            # previous layer's fwd/bwd halves consumed directly (no concat):
            # rows [:H] of W_ih act on the fwd half, rows [H:] on the bwd half.
            gi = (jnp.einsum("tbh,dhg->dtbg", out_f, w_ih[:, :H, :]) +
                  jnp.einsum("tbh,dhg->dtbg", out_b, w_ih[:, H:, :]))
        gi = (gi + b_gi[:, None, None, :]).astype(jnp.bfloat16)   # (2,Tp,Bp,3H)

        out_f, out_b, h_last = bigru_layer(
            gi, mask, w_hh.astype(jnp.bfloat16), b_hn, time_chunk=time_chunk)
        hiddens.append(h_last)
        # TODO(synk): inter-layer dropout (p=0.1) of nn.GRU omitted — it only
        # applies in training mode.

    outputs = (out_f + out_b)[:T, :B]                    # sum fwd + bwd halves
    hidden = jnp.concatenate(hiddens, axis=0)[:, :B]     # (n_layers*2, B, H)
    return outputs, hidden


# -----------------------------------------------------------------------------
# Deterministic parameter init (shapes match nn.GRU(H, H, n_layers, bidir=True),
# stored transposed and gate-fused: gates [r, z, n] concatenated on last axis)
# -----------------------------------------------------------------------------
def init_params(key, vocab_size, H, n_layers):
    bound = 1.0 / jnp.sqrt(jnp.float32(H))
    params = {}
    key, k_emb = jax.random.split(key)
    params["embedding"] = jax.random.normal(k_emb, (vocab_size, H), jnp.float32)
    for l in range(n_layers):
        in_dim = H if l == 0 else 2 * H
        key, k1, k2, k3, k4 = jax.random.split(key, 5)
        w_ih = jax.random.uniform(k1, (2, in_dim, 3 * H), jnp.float32, -bound, bound)
        b_ih = jax.random.uniform(k2, (2, 3 * H), jnp.float32, -bound, bound)
        w_hh = jax.random.uniform(k3, (2, H, 3 * H), jnp.float32, -bound, bound)
        b_hh = jax.random.uniform(k4, (2, 3 * H), jnp.float32, -bound, bound)
        params[f"l{l}"] = (w_ih, b_ih, w_hh, b_hh)
    return params


# -----------------------------------------------------------------------------
# Pure-JAX reference (lax.scan, f32 HIGHEST) for correctness check
# -----------------------------------------------------------------------------
def _ref_gru_dir(x, mask, w_ih, b_ih, w_hh, b_hh):
    B = x.shape[1]
    H = w_hh.shape[0]
    hp = lax.Precision.HIGHEST

    def step(h, inp):
        xt, mt = inp
        gi = jnp.dot(xt, w_ih, precision=hp) + b_ih
        gh = jnp.dot(h, w_hh, precision=hp) + b_hh
        r = jax.nn.sigmoid(gi[:, :H] + gh[:, :H])
        z = jax.nn.sigmoid(gi[:, H:2 * H] + gh[:, H:2 * H])
        n = jnp.tanh(gi[:, 2 * H:] + r * gh[:, 2 * H:])
        h_new = (1.0 - z) * n + z * h
        h_new = mt * h_new + (1.0 - mt) * h
        return h_new, h_new * mt

    h0 = jnp.zeros((B, H), jnp.float32)
    h_last, outs = lax.scan(step, h0, (x, mask))
    return outs, h_last


def encoder_rnn_reference(input_seqs, input_lengths, params, n_layers):
    emb = jnp.take(params["embedding"], input_seqs, axis=0)
    T = emb.shape[0]
    mask = (jnp.arange(T)[:, None] < input_lengths[None, :]).astype(jnp.float32)[..., None]
    x = emb
    hiddens = []
    out_f = out_b = None
    for l in range(n_layers):
        w_ih, b_ih, w_hh, b_hh = params[f"l{l}"]
        out_f, h_f = _ref_gru_dir(x, mask, w_ih[0], b_ih[0], w_hh[0], b_hh[0])
        out_b_rev, h_b = _ref_gru_dir(jnp.flip(x, 0), jnp.flip(mask, 0),
                                      w_ih[1], b_ih[1], w_hh[1], b_hh[1])
        out_b = jnp.flip(out_b_rev, 0)
        hiddens += [h_f, h_b]
        x = jnp.concatenate([out_f, out_b], axis=-1)
    return out_f + out_b, jnp.stack(hiddens, axis=0)


if __name__ == "__main__":
    # small shapes consistent with the module: seq=8, batch=2, hidden=32, vocab=20
    T, B, H, V, N_LAYERS = 8, 2, 32, 20, 2

    key = jax.random.PRNGKey(0)
    key, k_tok = jax.random.split(key)
    params = init_params(key, V, H, N_LAYERS)

    input_seqs = jax.random.randint(k_tok, (T, B), 0, V, dtype=jnp.int32)
    input_lengths = jnp.array([8, 5], dtype=jnp.int32)   # sorted descending (pack req.)

    fwd = jax.jit(functools.partial(encoder_rnn_forward,
                                    n_layers=N_LAYERS, time_chunk=4))
    outputs, hidden = fwd(input_seqs, input_lengths, params)
    jax.block_until_ready((outputs, hidden))

    ref_out, ref_hid = encoder_rnn_reference(input_seqs, input_lengths, params, N_LAYERS)
    assert outputs.shape == (T, B, H) and hidden.shape == (2 * N_LAYERS, B, H)
    # Kernel uses bf16 GI / W_hh (f32 gate math); reference is f32 HIGHEST,
    # so the tolerance is set to bf16 level. Semantic bugs would be >> 0.04.
    assert jnp.allclose(outputs, ref_out, atol=4e-2, rtol=4e-2)
    assert jnp.allclose(hidden, ref_hid, atol=4e-2, rtol=4e-2)

    print("KERNEL_OK")
</pallas_src>

<mosaic_0001>
module attributes {stable_mosaic.version = 11 : i64} {
  func.func @_bigru_chunk_kernel(%arg0: i32, %arg1: memref<1x4x8x96xbf16, #tpu.memory_space<vmem>>, %arg2: memref<1x4x8x96xbf16, #tpu.memory_space<vmem>>, %arg3: memref<4x8x1xf32, #tpu.memory_space<vmem>>, %arg4: memref<4x8x1xf32, #tpu.memory_space<vmem>>, %arg5: memref<2x32x96xbf16, #tpu.memory_space<vmem>>, %arg6: memref<2x1x32xf32, #tpu.memory_space<vmem>>, %arg7: memref<4x8x32xf32, #tpu.memory_space<vmem>>, %arg8: memref<4x8x32xf32, #tpu.memory_space<vmem>>, %arg9: memref<2x8x32xf32, #tpu.memory_space<vmem>>, %arg10: memref<2x8x32xf32, #tpu.memory_space<vmem>>) attributes {dimension_semantics = [#tpu.dimension_semantics<arbitrary>], iteration_bounds = array<i64: 2>, scalar_prefetch = 0 : i64, scratch_operands = 1 : i64, tpu.core_type = #tpu.core_type<tc>, window_params = [{transform_indices = @transform_0, window_bounds = array<i64: 1, 4, 8, 96>}, {transform_indices = @transform_1, window_bounds = array<i64: 1, 4, 8, 96>}, {transform_indices = @transform_2, window_bounds = array<i64: 4, 8, 1>}, {transform_indices = @transform_3, window_bounds = array<i64: 4, 8, 1>}, {pipeline_mode = #tpu.pipeline_mode<synchronous>, transform_indices = @transform_4, window_bounds = array<i64: 2, 32, 96>}, {pipeline_mode = #tpu.pipeline_mode<synchronous>, transform_indices = @transform_5, window_bounds = array<i64: 2, 1, 32>}, {transform_indices = @transform_6, window_bounds = array<i64: 4, 8, 32>}, {transform_indices = @transform_7, window_bounds = array<i64: 4, 8, 32>}, {pipeline_mode = #tpu.pipeline_mode<synchronous>, transform_indices = @transform_8, window_bounds = array<i64: 2, 8, 32>}]} {
    %c0_i32 = arith.constant 0 : i32
    %0 = arith.cmpi eq, %arg0, %c0_i32 : i32
    %1 = arith.extui %0 : i1 to i32
    %c0_i32_0 = arith.constant 0 : i32
    %2 = arith.cmpi ne, %1, %c0_i32_0 : i32
    scf.if %2 {
      %cst_146 = arith.constant 0.000000e+00 : f32
      %387 = vector.broadcast %cst_146 : f32 to vector<2x8x32xf32>
      %c0_147 = arith.constant 0 : index
      %c0_148 = arith.constant 0 : index
      %c0_149 = arith.constant 0 : index
      %388 = vector.load %arg10[%c0_147, %c0_148, %c0_149] : memref<2x8x32xf32, #tpu.memory_space<vmem>>, vector<2x8x32xf32>
      tpu.vector_store %arg10[%c0_147, %c0_148, %c0_149], %387 {strides = array<i32>} : memref<2x8x32xf32, #tpu.memory_space<vmem>>, vector<2x8x32xf32>,
    } else {
    }
    %c0 = arith.constant 0 : index
    %c0_1 = arith.constant 0 : index
    %c0_2 = arith.constant 0 : index
    %3 = vector.load %arg5[%c0, %c0_1, %c0_2] : memref<2x32x96xbf16, #tpu.memory_space<vmem>>, vector<1x32x96xbf16>
    %4 = vector.shape_cast %3 : vector<1x32x96xbf16> to vector<32x96xbf16>
    %c1 = arith.constant 1 : index
    %c0_3 = arith.constant 0 : index
    %c0_4 = arith.constant 0 : index
    %5 = vector.load %arg5[%c1, %c0_3, %c0_4] : memref<2x32x96xbf16, #tpu.memory_space<vmem>>, vector<1x32x96xbf16>
    %6 = vector.shape_cast %5 : vector<1x32x96xbf16> to vector<32x96xbf16>
    %c0_5 = arith.constant 0 : index
    %c0_6 = arith.constant 0 : index
    %c0_7 = arith.constant 0 : index
    %7 = vector.load %arg6[%c0_5, %c0_6, %c0_7] : memref<2x1x32xf32, #tpu.memory_space<vmem>>, vector<1x1x32xf32>
    %8 = vector.shape_cast %7 : vector<1x1x32xf32> to vector<1x32xf32>
    %c1_8 = arith.constant 1 : index
    %c0_9 = arith.constant 0 : index
    %c0_10 = arith.constant 0 : index
    %9 = vector.load %arg6[%c1_8, %c0_9, %c0_10] : memref<2x1x32xf32, #tpu.memory_space<vmem>>, vector<1x1x32xf32>
    %10 = vector.shape_cast %9 : vector<1x1x32xf32> to vector<1x32xf32>
    %c0_11 = arith.constant 0 : index
    %c0_12 = arith.constant 0 : index
    %c0_13 = arith.constant 0 : index
    %11 = vector.load %arg10[%c0_11, %c0_12, %c0_13] : memref<2x8x32xf32, #tpu.memory_space<vmem>>, vector<1x8x32xf32>
    %12 = vector.shape_cast %11 : vector<1x8x32xf32> to vector<8x32xf32>
    %c1_14 = arith.constant 1 : index
    %c0_15 = arith.constant 0 : index
    %c0_16 = arith.constant 0 : index
    %13 = vector.load %arg10[%c1_14, %c0_15, %c0_16] : memref<2x8x32xf32, #tpu.memory_space<vmem>>, vector<1x8x32xf32>
    %14 = vector.shape_cast %13 : vector<1x8x32xf32> to vector<8x32xf32>
    %c0_17 = arith.constant 0 : index
    %c0_18 = arith.constant 0 : index
    %c0_19 = arith.constant 0 : index
    %c0_20 = arith.constant 0 : index
    %15 = vector.load %arg1[%c0_17, %c0_18, %c0_19, %c0_20] : memref<1x4x8x96xbf16, #tpu.memory_space<vmem>>, vector<1x1x8x96xbf16>
    %16 = vector.shape_cast %15 : vector<1x1x8x96xbf16> to vector<8x96xbf16>
    %17 = arith.extf %16 : vector<8x96xbf16> to vector<8x96xf32>
    %c0_21 = arith.constant 0 : index
    %c3 = arith.constant 3 : index
    %c0_22 = arith.constant 0 : index
    %c0_23 = arith.constant 0 : index
    %18 = vector.load %arg2[%c0_21, %c3, %c0_22, %c0_23] : memref<1x4x8x96xbf16, #tpu.memory_space<vmem>>, vector<1x1x8x96xbf16>
    %19 = vector.shape_cast %18 : vector<1x1x8x96xbf16> to vector<8x96xbf16>
    %20 = arith.extf %19 : vector<8x96xbf16> to vector<8x96xf32>
    %c0_24 = arith.constant 0 : index
    %c0_25 = arith.constant 0 : index
    %c0_26 = arith.constant 0 : index
    %21 = vector.load %arg3[%c0_24, %c0_25, %c0_26] : memref<4x8x1xf32, #tpu.memory_space<vmem>>, vector<1x8x1xf32>
    %22 = vector.shape_cast %21 : vector<1x8x1xf32> to vector<8x1xf32>
    %c3_27 = arith.constant 3 : index
    %c0_28 = arith.constant 0 : index
    %c0_29 = arith.constant 0 : index
    %23 = vector.load %arg4[%c3_27, %c0_28, %c0_29] : memref<4x8x1xf32, #tpu.memory_space<vmem>>, vector<1x8x1xf32>
    %24 = vector.shape_cast %23 : vector<1x8x1xf32> to vector<8x1xf32>
    %25 = arith.truncf %12 : vector<8x32xf32> to vector<8x32xbf16>
    %cst = arith.constant dense<0.000000e+00> : vector<8x96xf32>
    %26 = tpu.matmul %25, %4, %cst {dimension_numbers = #tpu.dot_dimension_numbers<[1], [0], [0], [1], [0, 0, 1, 1], [], []>} : vector<8x32xbf16>, vector<32x96xbf16>, vector<8x96xf32> -> vector<8x96xf32>
    %27 = arith.truncf %14 : vector<8x32xf32> to vector<8x32xbf16>
    %cst_30 = arith.constant dense<0.000000e+00> : vector<8x96xf32>
    %28 = tpu.matmul %27, %6, %cst_30 {dimension_numbers = #tpu.dot_dimension_numbers<[1], [0], [0], [1], [0, 0, 1, 1], [], []>} : vector<8x32xbf16>, vector<32x96xbf16>, vector<8x96xf32> -> vector<8x96xf32>
    %29 = vector.extract_strided_slice %17 {offsets = [0, 0], sizes = [8, 32], strides = [1, 1]} : vector<8x96xf32> to vector<8x32xf32>
    %30 = vector.extract_strided_slice %26 {offsets = [0, 0], sizes = [8, 32], strides = [1, 1]} : vector<8x96xf32> to vector<8x32xf32>
    %31 = arith.addf %29, %30 : vector<8x32xf32>
    %32 = arith.negf %31 : vector<8x32xf32>
    %33 = math.exp %32 : vector<8x32xf32>
    %cst_31 = arith.constant 1.000000e+00 : f32
    %34 = vector.broadcast %cst_31 : f32 to vector<8x32xf32>
    %35 = arith.addf %34, %33 : vector<8x32xf32>
    %36 = arith.divf %34, %35 : vector<8x32xf32>
    %37 = vector.extract_strided_slice %20 {offsets = [0, 0], sizes = [8, 32], strides = [1, 1]} : vector<8x96xf32> to vector<8x32xf32>
    %38 = vector.extract_strided_slice %28 {offsets = [0, 0], sizes = [8, 32], strides = [1, 1]} : vector<8x96xf32> to vector<8x32xf32>
    %39 = arith.addf %37, %38 : vector<8x32xf32>
    %40 = arith.negf %39 : vector<8x32xf32>
    %41 = math.exp %40 : vector<8x32xf32>
    %cst_32 = arith.constant 1.000000e+00 : f32
    %42 = vector.broadcast %cst_32 : f32 to vector<8x32xf32>
    %43 = arith.addf %42, %41 : vector<8x32xf32>
    %44 = arith.divf %42, %43 : vector<8x32xf32>
    %45 = vector.extract_strided_slice %17 {offsets = [0, 32], sizes = [8, 32], strides = [1, 1]} : vector<8x96xf32> to vector<8x32xf32>
    %46 = vector.extract_strided_slice %26 {offsets = [0, 32], sizes = [8, 32], strides = [1, 1]} : vector<8x96xf32> to vector<8x32xf32>
    %47 = arith.addf %45, %46 : vector<8x32xf32>
    %48 = arith.negf %47 : vector<8x32xf32>
    %49 = math.exp %48 : vector<8x32xf32>
    %cst_33 = arith.constant 1.000000e+00 : f32
    %50 = vector.broadcast %cst_33 : f32 to vector<8x32xf32>
    %51 = arith.addf %50, %49 : vector<8x32xf32>
    %52 = arith.divf %50, %51 : vector<8x32xf32>
    %53 = vector.extract_strided_slice %20 {offsets = [0, 32], sizes = [8, 32], strides = [1, 1]} : vector<8x96xf32> to vector<8x32xf32>
    %54 = vector.extract_strided_slice %28 {offsets = [0, 32], sizes = [8, 32], strides = [1, 1]} : vector<8x96xf32> to vector<8x32xf32>
    %55 = arith.addf %53, %54 : vector<8x32xf32>
    %56 = arith.negf %55 : vector<8x32xf32>
    %57 = math.exp %56 : vector<8x32xf32>
    %cst_34 = arith.constant 1.000000e+00 : f32
    %58 = vector.broadcast %cst_34 : f32 to vector<8x32xf32>
    %59 = arith.addf %58, %57 : vector<8x32xf32>
    %60 = arith.divf %58, %59 : vector<8x32xf32>
    %61 = vector.extract_strided_slice %17 {offsets = [0, 64], sizes = [8, 32], strides = [1, 1]} : vector<8x96xf32> to vector<8x32xf32>
    %62 = vector.extract_strided_slice %26 {offsets = [0, 64], sizes = [8, 32], strides = [1, 1]} : vector<8x96xf32> to vector<8x32xf32>
    %63 = vector.broadcast %8 : vector<1x32xf32> to vector<8x32xf32>
    %64 = arith.addf %62, %63 : vector<8x32xf32>
    %65 = arith.mulf %36, %64 : vector<8x32xf32>
    %66 = arith.addf %61, %65 : vector<8x32xf32>
    %67 = math.tanh %66 : vector<8x32xf32>
    %68 = vector.extract_strided_slice %20 {offsets = [0, 64], sizes = [8, 32], strides = [1, 1]} : vector<8x96xf32> to vector<8x32xf32>
    %69 = vector.extract_strided_slice %28 {offsets = [0, 64], sizes = [8, 32], strides = [1, 1]} : vector<8x96xf32> to vector<8x32xf32>
    %70 = vector.broadcast %10 : vector<1x32xf32> to vector<8x32xf32>
    %71 = arith.addf %69, %70 : vector<8x32xf32>
    %72 = arith.mulf %44, %71 : vector<8x32xf32>
    %73 = arith.addf %68, %72 : vector<8x32xf32>
    %74 = math.tanh %73 : vector<8x32xf32>
    %cst_35 = arith.constant 1.000000e+00 : f32
    %75 = vector.broadcast %cst_35 : f32 to vector<8x32xf32>
    %76 = arith.subf %75, %52 : vector<8x32xf32>
    %77 = arith.mulf %76, %67 : vector<8x32xf32>
    %78 = arith.mulf %52, %12 : vector<8x32xf32>
    %79 = arith.addf %77, %78 : vector<8x32xf32>
    %cst_36 = arith.constant 1.000000e+00 : f32
    %80 = vector.broadcast %cst_36 : f32 to vector<8x32xf32>
    %81 = arith.subf %80, %60 : vector<8x32xf32>
    %82 = arith.mulf %81, %74 : vector<8x32xf32>
    %83 = arith.mulf %60, %14 : vector<8x32xf32>
    %84 = arith.addf %82, %83 : vector<8x32xf32>
    %85 = vector.broadcast %22 : vector<8x1xf32> to vector<8x32xf32>
    %86 = arith.mulf %85, %79 : vector<8x32xf32>
    %87 = vector.broadcast %24 : vector<8x1xf32> to vector<8x32xf32>
    %88 = arith.mulf %87, %84 : vector<8x32xf32>
    %cst_37 = arith.constant 1.000000e+00 : f32
    %89 = vector.broadcast %cst_37 : f32 to vector<8x1xf32>
    %90 = arith.subf %89, %22 : vector<8x1xf32>
    %91 = vector.broadcast %90 : vector<8x1xf32> to vector<8x32xf32>
    %92 = arith.mulf %91, %12 : vector<8x32xf32>
    %93 = arith.addf %86, %92 : vector<8x32xf32>
    %cst_38 = arith.constant 1.000000e+00 : f32
    %94 = vector.broadcast %cst_38 : f32 to vector<8x1xf32>
    %95 = arith.subf %94, %24 : vector<8x1xf32>
    %96 = vector.broadcast %95 : vector<8x1xf32> to vector<8x32xf32>
    %97 = arith.mulf %96, %14 : vector<8x32xf32>
    %98 = arith.addf %88, %97 : vector<8x32xf32>
    %c0_39 = arith.constant 0 : index
    %c0_40 = arith.constant 0 : index
    %c0_41 = arith.constant 0 : index
    %99 = vector.load %arg7[%c0_39, %c0_40, %c0_41] : memref<4x8x32xf32, #tpu.memory_space<vmem>>, vector<1x8x32xf32>
    %100 = vector.shape_cast %99 : vector<1x8x32xf32> to vector<8x32xf32>
    %101 = vector.shape_cast %86 : vector<8x32xf32> to vector<1x8x32xf32>
    tpu.vector_store %arg7[%c0_39, %c0_40, %c0_41], %101 {strides = array<i32>} : memref<4x8x32xf32, #tpu.memory_space<vmem>>, vector<1x8x32xf32>,
    %c3_42 = arith.constant 3 : index
    %c0_43 = arith.constant 0 : index
    %c0_44 = arith.constant 0 : index
    %102 = vector.load %arg8[%c3_42, %c0_43, %c0_44] : memref<4x8x32xf32, #tpu.memory_space<vmem>>, vector<1x8x32xf32>
    %103 = vector.shape_cast %102 : vector<1x8x32xf32> to vector<8x32xf32>
    %104 = vector.shape_cast %88 : vector<8x32xf32> to vector<1x8x32xf32>
    tpu.vector_store %arg8[%c3_42, %c0_43, %c0_44], %104 {strides = array<i32>} : memref<4x8x32xf32, #tpu.memory_space<vmem>>, vector<1x8x32xf32>,
    %c0_45 = arith.constant 0 : index
    %c1_46 = arith.constant 1 : index
    %c0_47 = arith.constant 0 : index
    %c0_48 = arith.constant 0 : index
    %105 = vector.load %arg1[%c0_45, %c1_46, %c0_47, %c0_48] : memref<1x4x8x96xbf16, #tpu.memory_space<vmem>>, vector<1x1x8x96xbf16>
    %106 = vector.shape_cast %105 : vector<1x1x8x96xbf16> to vector<8x96xbf16>
    %107 = arith.extf %106 : vector<8x96xbf16> to vector<8x96xf32>
    %c0_49 = arith.constant 0 : index
    %c2 = arith.constant 2 : index
    %c0_50 = arith.constant 0 : index
    %c0_51 = arith.constant 0 : index
    %108 = vector.load %arg2[%c0_49, %c2, %c0_50, %c0_51] : memref<1x4x8x96xbf16, #tpu.memory_space<vmem>>, vector<1x1x8x96xbf16>
    %109 = vector.shape_cast %108 : vector<1x1x8x96xbf16> to vector<8x96xbf16>
    %110 = arith.extf %109 : vector<8x96xbf16> to vector<8x96xf32>
    %c1_52 = arith.constant 1 : index
    %c0_53 = arith.constant 0 : index
    %c0_54 = arith.constant 0 : index
    %111 = vector.load %arg3[%c1_52, %c0_53, %c0_54] : memref<4x8x1xf32, #tpu.memory_space<vmem>>, vector<1x8x1xf32>
    %112 = vector.shape_cast %111 : vector<1x8x1xf32> to vector<8x1xf32>
    %c2_55 = arith.constant 2 : index
    %c0_56 = arith.constant 0 : index
    %c0_57 = arith.constant 0 : index
    %113 = vector.load %arg4[%c2_55, %c0_56, %c0_57] : memref<4x8x1xf32, #tpu.memory_space<vmem>>, vector<1x8x1xf32>
    %114 = vector.shape_cast %113 : vector<1x8x1xf32> to vector<8x1xf32>
    %115 = arith.truncf %93 : vector<8x32xf32> to vector<8x32xbf16>
    %cst_58 = arith.constant dense<0.000000e+00> : vector<8x96xf32>
    %116 = tpu.matmul %115, %4, %cst_58 {dimension_numbers = #tpu.dot_dimension_numbers<[1], [0], [0], [1], [0, 0, 1, 1], [], []>} : vector<8x32xbf16>, vector<32x96xbf16>, vector<8x96xf32> -> vector<8x96xf32>
    %117 = arith.truncf %98 : vector<8x32xf32> to vector<8x32xbf16>
    %cst_59 = arith.constant dense<0.000000e+00> : vector<8x96xf32>
    %118 = tpu.matmul %117, %6, %cst_59 {dimension_numbers = #tpu.dot_dimension_numbers<[1], [0], [0], [1], [0, 0, 1, 1], [], []>} : vector<8x32xbf16>, vector<32x96xbf16>, vector<8x96xf32> -> vector<8x96xf32>
    %119 = vector.extract_strided_slice %107 {offsets = [0, 0], sizes = [8, 32], strides = [1, 1]} : vector<8x96xf32> to vector<8x32xf32>
    %120 = vector.extract_strided_slice %116 {offsets = [0, 0], sizes = [8, 32], strides = [1, 1]} : vector<8x96xf32> to vector<8x32xf32>
    %121 = arith.addf %119, %120 : vector<8x32xf32>
    %122 = arith.negf %121 : vector<8x32xf32>
    %123 = math.exp %122 : vector<8x32xf32>
    %cst_60 = arith.constant 1.000000e+00 : f32
    %124 = vector.broadcast %cst_60 : f32 to vector<8x32xf32>
    %125 = arith.addf %124, %123 : vector<8x32xf32>
    %126 = arith.divf %124, %125 : vector<8x32xf32>
    %127 = vector.extract_strided_slice %110 {offsets = [0, 0], sizes = [8, 32], strides = [1, 1]} : vector<8x96xf32> to vector<8x32xf32>
    %128 = vector.extract_strided_slice %118 {offsets = [0, 0], sizes = [8, 32], strides = [1, 1]} : vector<8x96xf32> to vector<8x32xf32>
    %129 = arith.addf %127, %128 : vector<8x32xf32>
    %130 = arith.negf %129 : vector<8x32xf32>
    %131 = math.exp %130 : vector<8x32xf32>
    %cst_61 = arith.constant 1.000000e+00 : f32
    %132 = vector.broadcast %cst_61 : f32 to vector<8x32xf32>
    %133 = arith.addf %132, %131 : vector<8x32xf32>
    %134 = arith.divf %132, %133 : vector<8x32xf32>
    %135 = vector.extract_strided_slice %107 {offsets = [0, 32], sizes = [8, 32], strides = [1, 1]} : vector<8x96xf32> to vector<8x32xf32>
    %136 = vector.extract_strided_slice %116 {offsets = [0, 32], sizes = [8, 32], strides = [1, 1]} : vector<8x96xf32> to vector<8x32xf32>
    %137 = arith.addf %135, %136 : vector<8x32xf32>
    %138 = arith.negf %137 : vector<8x32xf32>
    %139 = math.exp %138 : vector<8x32xf32>
    %cst_62 = arith.constant 1.000000e+00 : f32
    %140 = vector.broadcast %cst_62 : f32 to vector<8x32xf32>
    %141 = arith.addf %140, %139 : vector<8x32xf32>
    %142 = arith.divf %140, %141 : vector<8x32xf32>
    %143 = vector.extract_strided_slice %110 {offsets = [0, 32], sizes = [8, 32], strides = [1, 1]} : vector<8x96xf32> to vector<8x32xf32>
    %144 = vector.extract_strided_slice %118 {offsets = [0, 32], sizes = [8, 32], strides = [1, 1]} : vector<8x96xf32> to vector<8x32xf32>
    %145 = arith.addf %143, %144 : vector<8x32xf32>
    %146 = arith.negf %145 : vector<8x32xf32>
    %147 = math.exp %146 : vector<8x32xf32>
    %cst_63 = arith.constant 1.000000e+00 : f32
    %148 = vector.broadcast %cst_63 : f32 to vector<8x32xf32>
    %149 = arith.addf %148, %147 : vector<8x32xf32>
    %150 = arith.divf %148, %149 : vector<8x32xf32>
    %151 = vector.extract_strided_slice %107 {offsets = [0, 64], sizes = [8, 32], strides = [1, 1]} : vector<8x96xf32> to vector<8x32xf32>
    %152 = vector.extract_strided_slice %116 {offsets = [0, 64], sizes = [8, 32], strides = [1, 1]} : vector<8x96xf32> to vector<8x32xf32>
    %153 = vector.broadcast %8 : vector<1x32xf32> to vector<8x32xf32>
    %154 = arith.addf %152, %153 : vector<8x32xf32>
    %155 = arith.mulf %126, %154 : vector<8x32xf32>
    %156 = arith.addf %151, %155 : vector<8x32xf32>
    %157 = math.tanh %156 : vector<8x32xf32>
    %158 = vector.extract_strided_slice %110 {offsets = [0, 64], sizes = [8, 32], strides = [1, 1]} : vector<8x96xf32> to vector<8x32xf32>
    %159 = vector.extract_strided_slice %118 {offsets = [0, 64], sizes = [8, 32], strides = [1, 1]} : vector<8x96xf32> to vector<8x32xf32>
    %160 = vector.broadcast %10 : vector<1x32xf32> to vector<8x32xf32>
    %161 = arith.addf %159, %160 : vector<8x32xf32>
    %162 = arith.mulf %134, %161 : vector<8x32xf32>
    %163 = arith.addf %158, %162 : vector<8x32xf32>
    %164 = math.tanh %163 : vector<8x32xf32>
    %cst_64 = arith.constant 1.000000e+00 : f32
    %165 = vector.broadcast %cst_64 : f32 to vector<8x32xf32>
    %166 = arith.subf %165, %142 : vector<8x32xf32>
    %167 = arith.mulf %166, %157 : vector<8x32xf32>
    %168 = arith.mulf %142, %93 : vector<8x32xf32>
    %169 = arith.addf %167, %168 : vector<8x32xf32>
    %cst_65 = arith.constant 1.000000e+00 : f32
    %170 = vector.broadcast %cst_65 : f32 to vector<8x32xf32>
    %171 = arith.subf %170, %150 : vector<8x32xf32>
    %172 = arith.mulf %171, %164 : vector<8x32xf32>
    %173 = arith.mulf %150, %98 : vector<8x32xf32>
    %174 = arith.addf %172, %173 : vector<8x32xf32>
    %175 = vector.broadcast %112 : vector<8x1xf32> to vector<8x32xf32>
    %176 = arith.mulf %175, %169 : vector<8x32xf32>
    %177 = vector.broadcast %114 : vector<8x1xf32> to vector<8x32xf32>
    %178 = arith.mulf %177, %174 : vector<8x32xf32>
    %cst_66 = arith.constant 1.000000e+00 : f32
    %179 = vector.broadcast %cst_66 : f32 to vector<8x1xf32>
    %180 = arith.subf %179, %112 : vector<8x1xf32>
    %181 = vector.broadcast %180 : vector<8x1xf32> to vector<8x32xf32>
    %182 = arith.mulf %181, %93 : vector<8x32xf32>
    %183 = arith.addf %176, %182 : vector<8x32xf32>
    %cst_67 = arith.constant 1.000000e+00 : f32
    %184 = vector.broadcast %cst_67 : f32 to vector<8x1xf32>
    %185 = arith.subf %184, %114 : vector<8x1xf32>
    %186 = vector.broadcast %185 : vector<8x1xf32> to vector<8x32xf32>
    %187 = arith.mulf %186, %98 : vector<8x32xf32>
    %188 = arith.addf %178, %187 : vector<8x32xf32>
    %c1_68 = arith.constant 1 : index
    %c0_69 = arith.constant 0 : index
    %c0_70 = arith.constant 0 : index
    %189 = vector.load %arg7[%c1_68, %c0_69, %c0_70] : memref<4x8x32xf32, #tpu.memory_space<vmem>>, vector<1x8x32xf32>
    %190 = vector.shape_cast %189 : vector<1x8x32xf32> to vector<8x32xf32>
    %191 = vector.shape_cast %176 : vector<8x32xf32> to vector<1x8x32xf32>
    tpu.vector_store %arg7[%c1_68, %c0_69, %c0_70], %191 {strides = array<i32>} : memref<4x8x32xf32, #tpu.memory_space<vmem>>, vector<1x8x32xf32>,
    %c2_71 = arith.constant 2 : index
    %c0_72 = arith.constant 0 : index
    %c0_73 = arith.constant 0 : index
    %192 = vector.load %arg8[%c2_71, %c0_72, %c0_73] : memref<4x8x32xf32, #tpu.memory_space<vmem>>, vector<1x8x32xf32>
    %193 = vector.shape_cast %192 : vector<1x8x32xf32> to vector<8x32xf32>
    %194 = vector.shape_cast %178 : vector<8x32xf32> to vector<1x8x32xf32>
    tpu.vector_store %arg8[%c2_71, %c0_72, %c0_73], %194 {strides = array<i32>} : memref<4x8x32xf32, #tpu.memory_space<vmem>>, vector<1x8x32xf32>,
    %c0_74 = arith.constant 0 : index
    %c2_75 = arith.constant 2 : index
    %c0_76 = arith.constant 0 : index
    %c0_77 = arith.constant 0 : index
    %195 = vector.load %arg1[%c0_74, %c2_75, %c0_76, %c0_77] : memref<1x4x8x96xbf16, #tpu.memory_space<vmem>>, vector<1x1x8x96xbf16>
    %196 = vector.shape_cast %195 : vector<1x1x8x96xbf16> to vector<8x96xbf16>
    %197 = arith.extf %196 : vector<8x96xbf16> to vector<8x96xf32>
    %c0_78 = arith.constant 0 : index
    %c1_79 = arith.constant 1 : index
    %c0_80 = arith.constant 0 : index
    %c0_81 = arith.constant 0 : index
    %198 = vector.load %arg2[%c0_78, %c1_79, %c0_80, %c0_81] : memref<1x4x8x96xbf16, #tpu.memory_space<vmem>>, vector<1x1x8x96xbf16>
    %199 = vector.shape_cast %198 : vector<1x1x8x96xbf16> to vector<8x96xbf16>
    %200 = arith.extf %199 : vector<8x96xbf16> to vector<8x96xf32>
    %c2_82 = arith.constant 2 : index
    %c0_83 = arith.constant 0 : index
    %c0_84 = arith.constant 0 : index
    %201 = vector.load %arg3[%c2_82, %c0_83, %c0_84] : memref<4x8x1xf32, #tpu.memory_space<vmem>>, vector<1x8x1xf32>
    %202 = vector.shape_cast %201 : vector<1x8x1xf32> to vector<8x1xf32>
    %c1_85 = arith.constant 1 : index
    %c0_86 = arith.constant 0 : index
    %c0_87 = arith.constant 0 : index
    %203 = vector.load %arg4[%c1_85, %c0_86, %c0_87] : memref<4x8x1xf32, #tpu.memory_space<vmem>>, vector<1x8x1xf32>
    %204 = vector.shape_cast %203 : vector<1x8x1xf32> to vector<8x1xf32>
    %205 = arith.truncf %183 : vector<8x32xf32> to vector<8x32xbf16>
    %cst_88 = arith.constant dense<0.000000e+00> : vector<8x96xf32>
    %206 = tpu.matmul %205, %4, %cst_88 {dimension_numbers = #tpu.dot_dimension_numbers<[1], [0], [0], [1], [0, 0, 1, 1], [], []>} : vector<8x32xbf16>, vector<32x96xbf16>, vector<8x96xf32> -> vector<8x96xf32>
    %207 = arith.truncf %188 : vector<8x32xf32> to vector<8x32xbf16>
    %cst_89 = arith.constant dense<0.000000e+00> : vector<8x96xf32>
    %208 = tpu.matmul %207, %6, %cst_89 {dimension_numbers = #tpu.dot_dimension_numbers<[1], [0], [0], [1], [0, 0, 1, 1], [], []>} : vector<8x32xbf16>, vector<32x96xbf16>, vector<8x96xf32> -> vector<8x96xf32>
    %209 = vector.extract_strided_slice %197 {offsets = [0, 0], sizes = [8, 32], strides = [1, 1]} : vector<8x96xf32> to vector<8x32xf32>
    %210 = vector.extract_strided_slice %206 {offsets = [0, 0], sizes = [8, 32], strides = [1, 1]} : vector<8x96xf32> to vector<8x32xf32>
    %211 = arith.addf %209, %210 : vector<8x32xf32>
    %212 = arith.negf %211 : vector<8x32xf32>
    %213 = math.exp %212 : vector<8x32xf32>
    %cst_90 = arith.constant 1.000000e+00 : f32
    %214 = vector.broadcast %cst_90 : f32 to vector<8x32xf32>
    %215 = arith.addf %214, %213 : vector<8x32xf32>
    %216 = arith.divf %214, %215 : vector<8x32xf32>
    %217 = vector.extract_strided_slice %200 {offsets = [0, 0], sizes = [8, 32], strides = [1, 1]} : vector<8x96xf32> to vector<8x32xf32>
    %218 = vector.extract_strided_slice %208 {offsets = [0, 0], sizes = [8, 32], strides = [1, 1]} : vector<8x96xf32> to vector<8x32xf32>
    %219 = arith.addf %217, %218 : vector<8x32xf32>
    %220 = arith.negf %219 : vector<8x32xf32>
    %221 = math.exp %220 : vector<8x32xf32>
    %cst_91 = arith.constant 1.000000e+00 : f32
    %222 = vector.broadcast %cst_91 : f32 to vector<8x32xf32>
    %223 = arith.addf %222, %221 : vector<8x32xf32>
    %224 = arith.divf %222, %223 : vector<8x32xf32>
    %225 = vector.extract_strided_slice %197 {offsets = [0, 32], sizes = [8, 32], strides = [1, 1]} : vector<8x96xf32> to vector<8x32xf32>
    %226 = vector.extract_strided_slice %206 {offsets = [0, 32], sizes = [8, 32], strides = [1, 1]} : vector<8x96xf32> to vector<8x32xf32>
    %227 = arith.addf %225, %226 : vector<8x32xf32>
    %228 = arith.negf %227 : vector<8x32xf32>
    %229 = math.exp %228 : vector<8x32xf32>
    %cst_92 = arith.constant 1.000000e+00 : f32
    %230 = vector.broadcast %cst_92 : f32 to vector<8x32xf32>
    %231 = arith.addf %230, %229 : vector<8x32xf32>
    %232 = arith.divf %230, %231 : vector<8x32xf32>
    %233 = vector.extract_strided_slice %200 {offsets = [0, 32], sizes = [8, 32], strides = [1, 1]} : vector<8x96xf32> to vector<8x32xf32>
    %234 = vector.extract_strided_slice %208 {offsets = [0, 32], sizes = [8, 32], strides = [1, 1]} : vector<8x96xf32> to vector<8x32xf32>
    %235 = arith.addf %233, %234 : vector<8x32xf32>
    %236 = arith.negf %235 : vector<8x32xf32>
    %237 = math.exp %236 : vector<8x32xf32>
    %cst_93 = arith.constant 1.000000e+00 : f32
    %238 = vector.broadcast %cst_93 : f32 to vector<8x32xf32>
    %239 = arith.addf %238, %237 : vector<8x32xf32>
    %240 = arith.divf %238, %239 : vector<8x32xf32>
    %241 = vector.extract_strided_slice %197 {offsets = [0, 64], sizes = [8, 32], strides = [1, 1]} : vector<8x96xf32> to vector<8x32xf32>
    %242 = vector.extract_strided_slice %206 {offsets = [0, 64], sizes = [8, 32], strides = [1, 1]} : vector<8x96xf32> to vector<8x32xf32>
    %243 = vector.broadcast %8 : vector<1x32xf32> to vector<8x32xf32>
    %244 = arith.addf %242, %243 : vector<8x32xf32>
    %245 = arith.mulf %216, %244 : vector<8x32xf32>
    %246 = arith.addf %241, %245 : vector<8x32xf32>
    %247 = math.tanh %246 : vector<8x32xf32>
    %248 = vector.extract_strided_slice %200 {offsets = [0, 64], sizes = [8, 32], strides = [1, 1]} : vector<8x96xf32> to vector<8x32xf32>
    %249 = vector.extract_strided_slice %208 {offsets = [0, 64], sizes = [8, 32], strides = [1, 1]} : vector<8x96xf32> to vector<8x32xf32>
    %250 = vector.broadcast %10 : vector<1x32xf32> to vector<8x32xf32>
    %251 = arith.addf %249, %250 : vector<8x32xf32>
    %252 = arith.mulf %224, %251 : vector<8x32xf32>
    %253 = arith.addf %248, %252 : vector<8x32xf32>
    %254 = math.tanh %253 : vector<8x32xf32>
    %cst_94 = arith.constant 1.000000e+00 : f32
    %255 = vector.broadcast %cst_94 : f32 to vector<8x32xf32>
    %256 = arith.subf %255, %232 : vector<8x32xf32>
    %257 = arith.mulf %256, %247 : vector<8x32xf32>
    %258 = arith.mulf %232, %183 : vector<8x32xf32>
    %259 = arith.addf %257, %258 : vector<8x32xf32>
    %cst_95 = arith.constant 1.000000e+00 : f32
    %260 = vector.broadcast %cst_95 : f32 to vector<8x32xf32>
    %261 = arith.subf %260, %240 : vector<8x32xf32>
    %262 = arith.mulf %261, %254 : vector<8x32xf32>
    %263 = arith.mulf %240, %188 : vector<8x32xf32>
    %264 = arith.addf %262, %263 : vector<8x32xf32>
    %265 = vector.broadcast %202 : vector<8x1xf32> to vector<8x32xf32>
    %266 = arith.mulf %265, %259 : vector<8x32xf32>
    %267 = vector.broadcast %204 : vector<8x1xf32> to vector<8x32xf32>
    %268 = arith.mulf %267, %264 : vector<8x32xf32>
    %cst_96 = arith.constant 1.000000e+00 : f32
    %269 = vector.broadcast %cst_96 : f32 to vector<8x1xf32>
    %270 = arith.subf %269, %202 : vector<8x1xf32>
    %271 = vector.broadcast %270 : vector<8x1xf32> to vector<8x32xf32>
    %272 = arith.mulf %271, %183 : vector<8x32xf32>
    %273 = arith.addf %266, %272 : vector<8x32xf32>
    %cst_97 = arith.constant 1.000000e+00 : f32
    %274 = vector.broadcast %cst_97 : f32 to vector<8x1xf32>
    %275 = arith.subf %274, %204 : vector<8x1xf32>
    %276 = vector.broadcast %275 : vector<8x1xf32> to vector<8x32xf32>
    %277 = arith.mulf %276, %188 : vector<8x32xf32>
    %278 = arith.addf %268, %277 : vector<8x32xf32>
    %c2_98 = arith.constant 2 : index
    %c0_99 = arith.constant 0 : index
    %c0_100 = arith.constant 0 : index
    %279 = vector.load %arg7[%c2_98, %c0_99, %c0_100] : memref<4x8x32xf32, #tpu.memory_space<vmem>>, vector<1x8x32xf32>
    %280 = vector.shape_cast %279 : vector<1x8x32xf32> to vector<8x32xf32>
    %281 = vector.shape_cast %266 : vector<8x32xf32> to vector<1x8x32xf32>
    tpu.vector_store %arg7[%c2_98, %c0_99, %c0_100], %281 {strides = array<i32>} : memref<4x8x32xf32, #tpu.memory_space<vmem>>, vector<1x8x32xf32>,
    %c1_101 = arith.constant 1 : index
    %c0_102 = arith.constant 0 : index
    %c0_103 = arith.constant 0 : index
    %282 = vector.load %arg8[%c1_101, %c0_102, %c0_103] : memref<4x8x32xf32, #tpu.memory_space<vmem>>, vector<1x8x32xf32>
    %283 = vector.shape_cast %282 : vector<1x8x32xf32> to vector<8x32xf32>
    %284 = vector.shape_cast %268 : vector<8x32xf32> to vector<1x8x32xf32>
    tpu.vector_store %arg8[%c1_101, %c0_102, %c0_103], %284 {strides = array<i32>} : memref<4x8x32xf32, #tpu.memory_space<vmem>>, vector<1x8x32xf32>,
    %c0_104 = arith.constant 0 : index
    %c3_105 = arith.constant 3 : index
    %c0_106 = arith.constant 0 : index
    %c0_107 = arith.constant 0 : index
    %285 = vector.load %arg1[%c0_104, %c3_105, %c0_106, %c0_107] : memref<1x4x8x96xbf16, #tpu.memory_space<vmem>>, vector<1x1x8x96xbf16>
    %286 = vector.shape_cast %285 : vector<1x1x8x96xbf16> to vector<8x96xbf16>
    %287 = arith.extf %286 : vector<8x96xbf16> to vector<8x96xf32>
    %c0_108 = arith.constant 0 : index
    %c0_109 = arith.constant 0 : index
    %c0_110 = arith.constant 0 : index
    %c0_111 = arith.constant 0 : index
    %288 = vector.load %arg2[%c0_108, %c0_109, %c0_110, %c0_111] : memref<1x4x8x96xbf16, #tpu.memory_space<vmem>>, vector<1x1x8x96xbf16>
    %289 = vector.shape_cast %288 : vector<1x1x8x96xbf16> to vector<8x96xbf16>
    %290 = arith.extf %289 : vector<8x96xbf16> to vector<8x96xf32>
    %c3_112 = arith.constant 3 : index
    %c0_113 = arith.constant 0 : index
    %c0_114 = arith.constant 0 : index
    %291 = vector.load %arg3[%c3_112, %c0_113, %c0_114] : memref<4x8x1xf32, #tpu.memory_space<vmem>>, vector<1x8x1xf32>
    %292 = vector.shape_cast %291 : vector<1x8x1xf32> to vector<8x1xf32>
    %c0_115 = arith.constant 0 : index
    %c0_116 = arith.constant 0 : index
    %c0_117 = arith.constant 0 : index
    %293 = vector.load %arg4[%c0_115, %c0_116, %c0_117] : memref<4x8x1xf32, #tpu.memory_space<vmem>>, vector<1x8x1xf32>
    %294 = vector.shape_cast %293 : vector<1x8x1xf32> to vector<8x1xf32>
    %295 = arith.truncf %273 : vector<8x32xf32> to vector<8x32xbf16>
    %cst_118 = arith.constant dense<0.000000e+00> : vector<8x96xf32>
    %296 = tpu.matmul %295, %4, %cst_118 {dimension_numbers = #tpu.dot_dimension_numbers<[1], [0], [0], [1], [0, 0, 1, 1], [], []>} : vector<8x32xbf16>, vector<32x96xbf16>, vector<8x96xf32> -> vector<8x96xf32>
    %297 = arith.truncf %278 : vector<8x32xf32> to vector<8x32xbf16>
    %cst_119 = arith.constant dense<0.000000e+00> : vector<8x96xf32>
    %298 = tpu.matmul %297, %6, %cst_119 {dimension_numbers = #tpu.dot_dimension_numbers<[1], [0], [0], [1], [0, 0, 1, 1], [], []>} : vector<8x32xbf16>, vector<32x96xbf16>, vector<8x96xf32> -> vector<8x96xf32>
    %299 = vector.extract_strided_slice %287 {offsets = [0, 0], sizes = [8, 32], strides = [1, 1]} : vector<8x96xf32> to vector<8x32xf32>
    %300 = vector.extract_strided_slice %296 {offsets = [0, 0], sizes = [8, 32], strides = [1, 1]} : vector<8x96xf32> to vector<8x32xf32>
    %301 = arith.addf %299, %300 : vector<8x32xf32>
    %302 = arith.negf %301 : vector<8x32xf32>
    %303 = math.exp %302 : vector<8x32xf32>
    %cst_120 = arith.constant 1.000000e+00 : f32
    %304 = vector.broadcast %cst_120 : f32 to vector<8x32xf32>
    %305 = arith.addf %304, %303 : vector<8x32xf32>
    %306 = arith.divf %304, %305 : vector<8x32xf32>
    %307 = vector.extract_strided_slice %290 {offsets = [0, 0], sizes = [8, 32], strides = [1, 1]} : vector<8x96xf32> to vector<8x32xf32>
    %308 = vector.extract_strided_slice %298 {offsets = [0, 0], sizes = [8, 32], strides = [1, 1]} : vector<8x96xf32> to vector<8x32xf32>
    %309 = arith.addf %307, %308 : vector<8x32xf32>
    %310 = arith.negf %309 : vector<8x32xf32>
    %311 = math.exp %310 : vector<8x32xf32>
    %cst_121 = arith.constant 1.000000e+00 : f32
    %312 = vector.broadcast %cst_121 : f32 to vector<8x32xf32>
    %313 = arith.addf %312, %311 : vector<8x32xf32>
    %314 = arith.divf %312, %313 : vector<8x32xf32>
    %315 = vector.extract_strided_slice %287 {offsets = [0, 32], sizes = [8, 32], strides = [1, 1]} : vector<8x96xf32> to vector<8x32xf32>
    %316 = vector.extract_strided_slice %296 {offsets = [0, 32], sizes = [8, 32], strides = [1, 1]} : vector<8x96xf32> to vector<8x32xf32>
    %317 = arith.addf %315, %316 : vector<8x32xf32>
    %318 = arith.negf %317 : vector<8x32xf32>
    %319 = math.exp %318 : vector<8x32xf32>
    %cst_122 = arith.constant 1.000000e+00 : f32
    %320 = vector.broadcast %cst_122 : f32 to vector<8x32xf32>
    %321 = arith.addf %320, %319 : vector<8x32xf32>
    %322 = arith.divf %320, %321 : vector<8x32xf32>
    %323 = vector.extract_strided_slice %290 {offsets = [0, 32], sizes = [8, 32], strides = [1, 1]} : vector<8x96xf32> to vector<8x32xf32>
    %324 = vector.extract_strided_slice %298 {offsets = [0, 32], sizes = [8, 32], strides = [1, 1]} : vector<8x96xf32> to vector<8x32xf32>
    %325 = arith.addf %323, %324 : vector<8x32xf32>
    %326 = arith.negf %325 : vector<8x32xf32>
    %327 = math.exp %326 : vector<8x32xf32>
    %cst_123 = arith.constant 1.000000e+00 : f32
    %328 = vector.broadcast %cst_123 : f32 to vector<8x32xf32>
    %329 = arith.addf %328, %327 : vector<8x32xf32>
    %330 = arith.divf %328, %329 : vector<8x32xf32>
    %331 = vector.extract_strided_slice %287 {offsets = [0, 64], sizes = [8, 32], strides = [1, 1]} : vector<8x96xf32> to vector<8x32xf32>
    %332 = vector.extract_strided_slice %296 {offsets = [0, 64], sizes = [8, 32], strides = [1, 1]} : vector<8x96xf32> to vector<8x32xf32>
    %333 = vector.broadcast %8 : vector<1x32xf32> to vector<8x32xf32>
    %334 = arith.addf %332, %333 : vector<8x32xf32>
    %335 = arith.mulf %306, %334 : vector<8x32xf32>
    %336 = arith.addf %331, %335 : vector<8x32xf32>
    %337 = math.tanh %336 : vector<8x32xf32>
    %338 = vector.extract_strided_slice %290 {offsets = [0, 64], sizes = [8, 32], strides = [1, 1]} : vector<8x96xf32> to vector<8x32xf32>
    %339 = vector.extract_strided_slice %298 {offsets = [0, 64], sizes = [8, 32], strides = [1, 1]} : vector<8x96xf32> to vector<8x32xf32>
    %340 = vector.broadcast %10 : vector<1x32xf32> to vector<8x32xf32>
    %341 = arith.addf %339, %340 : vector<8x32xf32>
    %342 = arith.mulf %314, %341 : vector<8x32xf32>
    %343 = arith.addf %338, %342 : vector<8x32xf32>
    %344 = math.tanh %343 : vector<8x32xf32>
    %cst_124 = arith.constant 1.000000e+00 : f32
    %345 = vector.broadcast %cst_124 : f32 to vector<8x32xf32>
    %346 = arith.subf %345, %322 : vector<8x32xf32>
    %347 = arith.mulf %346, %337 : vector<8x32xf32>
    %348 = arith.mulf %322, %273 : vector<8x32xf32>
    %349 = arith.addf %347, %348 : vector<8x32xf32>
    %cst_125 = arith.constant 1.000000e+00 : f32
    %350 = vector.broadcast %cst_125 : f32 to vector<8x32xf32>
    %351 = arith.subf %350, %330 : vector<8x32xf32>
    %352 = arith.mulf %351, %344 : vector<8x32xf32>
    %353 = arith.mulf %330, %278 : vector<8x32xf32>
    %354 = arith.addf %352, %353 : vector<8x32xf32>
    %355 = vector.broadcast %292 : vector<8x1xf32> to vector<8x32xf32>
    %356 = arith.mulf %355, %349 : vector<8x32xf32>
    %357 = vector.broadcast %294 : vector<8x1xf32> to vector<8x32xf32>
    %358 = arith.mulf %357, %354 : vector<8x32xf32>
    %cst_126 = arith.constant 1.000000e+00 : f32
    %359 = vector.broadcast %cst_126 : f32 to vector<8x1xf32>
    %360 = arith.subf %359, %292 : vector<8x1xf32>
    %361 = vector.broadcast %360 : vector<8x1xf32> to vector<8x32xf32>
    %362 = arith.mulf %361, %273 : vector<8x32xf32>
    %363 = arith.addf %356, %362 : vector<8x32xf32>
    %cst_127 = arith.constant 1.000000e+00 : f32
    %364 = vector.broadcast %cst_127 : f32 to vector<8x1xf32>
    %365 = arith.subf %364, %294 : vector<8x1xf32>
    %366 = vector.broadcast %365 : vector<8x1xf32> to vector<8x32xf32>
    %367 = arith.mulf %366, %278 : vector<8x32xf32>
    %368 = arith.addf %358, %367 : vector<8x32xf32>
    %c3_128 = arith.constant 3 : index
    %c0_129 = arith.constant 0 : index
    %c0_130 = arith.constant 0 : index
    %369 = vector.load %arg7[%c3_128, %c0_129, %c0_130] : memref<4x8x32xf32, #tpu.memory_space<vmem>>, vector<1x8x32xf32>
    %370 = vector.shape_cast %369 : vector<1x8x32xf32> to vector<8x32xf32>
    %371 = vector.shape_cast %356 : vector<8x32xf32> to vector<1x8x32xf32>
    tpu.vector_store %arg7[%c3_128, %c0_129, %c0_130], %371 {strides = array<i32>} : memref<4x8x32xf32, #tpu.memory_space<vmem>>, vector<1x8x32xf32>,
    %c0_131 = arith.constant 0 : index
    %c0_132 = arith.constant 0 : index
    %c0_133 = arith.constant 0 : index
    %372 = vector.load %arg8[%c0_131, %c0_132, %c0_133] : memref<4x8x32xf32, #tpu.memory_space<vmem>>, vector<1x8x32xf32>
    %373 = vector.shape_cast %372 : vector<1x8x32xf32> to vector<8x32xf32>
    %374 = vector.shape_cast %358 : vector<8x32xf32> to vector<1x8x32xf32>
    tpu.vector_store %arg8[%c0_131, %c0_132, %c0_133], %374 {strides = array<i32>} : memref<4x8x32xf32, #tpu.memory_space<vmem>>, vector<1x8x32xf32>,
    %c0_134 = arith.constant 0 : index
    %c0_135 = arith.constant 0 : index
    %c0_136 = arith.constant 0 : index
    %375 = vector.load %arg10[%c0_134, %c0_135, %c0_136] : memref<2x8x32xf32, #tpu.memory_space<vmem>>, vector<1x8x32xf32>
    %376 = vector.shape_cast %375 : vector<1x8x32xf32> to vector<8x32xf32>
    %377 = vector.shape_cast %363 : vector<8x32xf32> to vector<1x8x32xf32>
    tpu.vector_store %arg10[%c0_134, %c0_135, %c0_136], %377 {strides = array<i32>} : memref<2x8x32xf32, #tpu.memory_space<vmem>>, vector<1x8x32xf32>,
    %c1_137 = arith.constant 1 : index
    %c0_138 = arith.constant 0 : index
    %c0_139 = arith.constant 0 : index
    %378 = vector.load %arg10[%c1_137, %c0_138, %c0_139] : memref<2x8x32xf32, #tpu.memory_space<vmem>>, vector<1x8x32xf32>
    %379 = vector.shape_cast %378 : vector<1x8x32xf32> to vector<8x32xf32>
    %380 = vector.shape_cast %368 : vector<8x32xf32> to vector<1x8x32xf32>
    tpu.vector_store %arg10[%c1_137, %c0_138, %c0_139], %380 {strides = array<i32>} : memref<2x8x32xf32, #tpu.memory_space<vmem>>, vector<1x8x32xf32>,
    %c0_140 = arith.constant 0 : index
    %c0_141 = arith.constant 0 : index
    %c0_142 = arith.constant 0 : index
    %381 = vector.load %arg9[%c0_140, %c0_141, %c0_142] : memref<2x8x32xf32, #tpu.memory_space<vmem>>, vector<1x8x32xf32>
    %382 = vector.shape_cast %381 : vector<1x8x32xf32> to vector<8x32xf32>
    %383 = vector.shape_cast %363 : vector<8x32xf32> to vector<1x8x32xf32>
    tpu.vector_store %arg9[%c0_140, %c0_141, %c0_142], %383 {strides = array<i32>} : memref<2x8x32xf32, #tpu.memory_space<vmem>>, vector<1x8x32xf32>,
    %c1_143 = arith.constant 1 : index
    %c0_144 = arith.constant 0 : index
    %c0_145 = arith.constant 0 : index
    %384 = vector.load %arg9[%c1_143, %c0_144, %c0_145] : memref<2x8x32xf32, #tpu.memory_space<vmem>>, vector<1x8x32xf32>
    %385 = vector.shape_cast %384 : vector<1x8x32xf32> to vector<8x32xf32>
    %386 = vector.shape_cast %368 : vector<8x32xf32> to vector<1x8x32xf32>
    tpu.vector_store %arg9[%c1_143, %c0_144, %c0_145], %386 {strides = array<i32>} : memref<2x8x32xf32, #tpu.memory_space<vmem>>, vector<1x8x32xf32>,
    return
  }
  func.func @transform_0(%arg0: i32) -> (i32, i32, i32, i32) {
    %c0_i32 = arith.constant 0 : i32
    %c0_i32_0 = arith.constant 0 : i32
    %c0_i32_1 = arith.constant 0 : i32
    %c0_i32_2 = arith.constant 0 : i32
    return %c0_i32, %arg0, %c0_i32_0, %c0_i32_1 : i32, i32, i32, i32
  }
  func.func @transform_1(%arg0: i32) -> (i32, i32, i32, i32) {
    %c1_i32 = arith.constant 1 : i32
    %0 = arith.subi %c1_i32, %arg0 : i32
    %c1_i32_0 = arith.constant 1 : i32
    %c0_i32 = arith.constant 0 : i32
    %c0_i32_1 = arith.constant 0 : i32
    %c0_i32_2 = arith.constant 0 : i32
    return %c1_i32_0, %0, %c0_i32, %c0_i32_1 : i32, i32, i32, i32
  }
  func.func @transform_2(%arg0: i32) -> (i32, i32, i32) {
    %c0_i32 = arith.constant 0 : i32
    %c0_i32_0 = arith.constant 0 : i32
    %c0_i32_1 = arith.constant 0 : i32
    return %arg0, %c0_i32, %c0_i32_0 : i32, i32, i32
  }
  func.func @transform_3(%arg0: i32) -> (i32, i32, i32) {
    %c1_i32 = arith.constant 1 : i32
    %0 = arith.subi %c1_i32, %arg0 : i32
    %c0_i32 = arith.constant 0 : i32
    %c0_i32_0 = arith.constant 0 : i32
    %c0_i32_1 = arith.constant 0 : i32
    return %0, %c0_i32, %c0_i32_0 : i32, i32, i32
  }
  func.func @transform_4(%arg0: i32) -> (i32, i32, i32) {
    %c0_i32 = arith.constant 0 : i32
    %c0_i32_0 = arith.constant 0 : i32
    %c0_i32_1 = arith.constant 0 : i32
    %c0_i32_2 = arith.constant 0 : i32
    return %c0_i32, %c0_i32_0, %c0_i32_1 : i32, i32, i32
  }
  func.func @transform_5(%arg0: i32) -> (i32, i32, i32) {
    %c0_i32 = arith.constant 0 : i32
    %c0_i32_0 = arith.constant 0 : i32
    %c0_i32_1 = arith.constant 0 : i32
    %c0_i32_2 = arith.constant 0 : i32
    return %c0_i32, %c0_i32_0, %c0_i32_1 : i32, i32, i32
  }
  func.func @transform_6(%arg0: i32) -> (i32, i32, i32) {
    %c0_i32 = arith.constant 0 : i32
    %c0_i32_0 = arith.constant 0 : i32
    %c0_i32_1 = arith.constant 0 : i32
    return %arg0, %c0_i32, %c0_i32_0 : i32, i32, i32
  }
  func.func @transform_7(%arg0: i32) -> (i32, i32, i32) {
    %c1_i32 = arith.constant 1 : i32
    %0 = arith.subi %c1_i32, %arg0 : i32
    %c0_i32 = arith.constant 0 : i32
    %c0_i32_0 = arith.constant 0 : i32
    %c0_i32_1 = arith.constant 0 : i32
    return %0, %c0_i32, %c0_i32_0 : i32, i32, i32
  }
  func.func @transform_8(%arg0: i32) -> (i32, i32, i32) {
    %c0_i32 = arith.constant 0 : i32
    %c0_i32_0 = arith.constant 0 : i32
    %c0_i32_1 = arith.constant 0 : i32
    %c0_i32_2 = arith.constant 0 : i32
    return %c0_i32, %c0_i32_0, %c0_i32_1 : i32, i32, i32
  }
}

</mosaic_0001>

<bundles_post_ra>
// kernel: encoder_rnn_forward.2
= control target key start
LH: loop header
LB: loop body
LE: loop exit
PB: predicated region body
PF: predicated region fallthrough
CT: control target
= control target key end

     0   :  { %s1706_s27 = smov 0   ;;  %s2009_s0 = inlined_call_operand.vmem [shape: bf16[2,8,8,96], index: 0, kind: input, shape index: {}, may-alias: {0,1}]   ;;  %s2010_s1 = inlined_call_operand.vmem [shape: bf16[2,8,8,96], index: 1, kind: input, shape index: {}, may-alias: {0,1}]   ;;  %s2011_s2 = inlined_call_operand.vmem [shape: f32[8,8,1], index: 2, kind: input, shape index: {}, may-alias: {2,3}]   ;;  %s2012_s3 = inlined_call_operand.vmem [shape: f32[8,8,1], index: 3, kind: input, shape index: {}, may-alias: {2,3}]   ;;  %s2013_s4 = inlined_call_operand.vmem [shape: bf16[2,32,96], index: 4, kind: input, shape index: {}]   ;;  %s2014_s5 = inlined_call_operand.vmem [shape: f32[2,1,32], index: 5, kind: input, shape index: {}]   ;;  %s2015_s6 = inlined_call_operand.vmem [shape: f32[8,8,32], index: 6, kind: output, shape index: {0}]   ;;  %s2016_s7 = inlined_call_operand.vmem [shape: f32[8,8,32], index: 7, kind: output, shape index: {1}]   ;;  %s2017_s8 = inlined_call_operand.vmem [shape: f32[2,8,32], index: 8, kind: output, shape index: {2}]  }
   0x1 LB: > { %s1422_s28 = sadd.s32 4294967295, %s1652_s27   ;;  %p1426_p0 = scmp.ge.s32.totalorder %s1652_s27, 1  ;;  %s1652_s27 = sphi %s1706_s27, %s19_s27  }
   0x2   : > { %p307_p1 = scmp.lt.s32.totalorder %s1652_s27, 3 }
   0x4   : > { %p308_p2 = pnand %p1426_p0, %p307_p1 }
   0x5   : > { %s1427_s29 = sshll.u32 (!%p308_p2), %s1422_s28, 2  ;;  %s371_s30 = ssub.s32 (!%p308_p2), 1, %s1422_s28 }
   0x6   : > { %311 = sbr.rel (%p308_p2) target bundleno = 2770 (0xad2), region = 44  ;;  %p366_p3 = scmp.lt.s32.totalorder (!%p308_p2), %s1427_s29, 7 }
   0x7   : > { %s1429_s9 = sshll.u32 (!%p308_p2), %s371_s30, 2  ;;  %p1439_p5 = scmp.ne.s32.totalorder (!%p308_p2), %s1422_s28, 0 }
   0x8   : > { %p373_p4 = scmp.lt.s32.totalorder (!%p308_p2), %s1429_s9, 7 }
   0xb   : > { %s2019_s29 = smov (!%p366_p3, %s1427_s29), 7  ;;  %s2021_s9 = smov (!%p373_p4, %s1429_s9), 7 }
   0xc   : > { %s1428_s10 = sshll.u32 %s2019_s29, 2  ;;  %s1432_s11 = sshll.u32 %s2019_s29, 3 }
   0xd   : > { %s1717_s14 = scalar_lea.vmem %s2009_s0, %s1428_s10  ;;  %s1430_s15 = sshll.u32 %s2021_s9, 2 }
   0xe   : > { %s1722_s18 = scalar_lea.vmem %s2010_s1, %s1430_s15  ;;  %s1727_s21 = scalar_lea.vmem %s2011_s2, %s1432_s11 }
   0xf   : > { %s1434_s22 = sshll.u32 %s2021_s9, 3  ;;  %s1732_s25 = scalar_lea.vmem %s2015_s6, %s1432_s11 }
  0x10   : > { %s1737_s30 = scalar_lea.vmem %s2012_s3, %s1434_s22  ;;  %s1742_s13 = scalar_lea.vmem %s2016_s7, %s1434_s22 }
  0x11   : > { %412 = sbr.rel (%p1439_p5) target bundleno = 24 (0x18), region = 48 }
  0x16   : > { %vm413_vm0 = vcmask 261120   ;;  %v1654_v0 = vmov 0.0  }
  0x17   : > { %414 = vst.msk [vmem:[#allocation2] sm:$0xff] %vm413_vm0, %v1654_v0  ;;  %415 = vst.msk [vmem:[#allocation2 + $0x8] sm:$0xff] %vm413_vm0, %v1654_v0 }
  0x18 PF: > { %v1747_v1 = vld [vmem:[%s2013_s4 + $0x8] sm:$0xff]   ;;  %v1655_v2 = vmov 0.0   ;;  %v1754_v3 = vld [vmem:[%s2013_s4 + $0x18] sm:$0xff]   ;;  %v1760_v4 = vld [vmem:[%s2013_s4] sm:$0xff]   ;;  %vm1656_vm1 = vmmov 0   ;;  %s1657_s24 = smov 64  }
  0x19   : > { %1513 = vmatprep.subr.bf16.mxu0 %v1655_v2  ;;  %1521 = vmatprep.subr.bf16.mxu1 %v1655_v2  ;;  %v1769_v5 = vld [vmem:[%s2013_s4 + $0x10] sm:$0xff]   ;;  %v1455_v8 = vld [vmem:[%s2014_s5] ss:$0 sm:$0xff]  ;;  %vm452_vm2 = vcmask 261120   ;;  %v1456_v11 = vld [vmem:[%s2014_s5 + $0x1] ss:$0 sm:$0xff] }
  0x1a   : > { %1514 = vmatpush3.bf16.msra.mxu0 %v1747_v1  ;;  %1517 = vmatprep.mubr.msk.bf16.mxu0 %vm1656_vm1, %v1655_v2  ;;  %v1658_v13 = vmov 0   ;;  %v1817_v25 = vld [vmem:[%s1717_s14] sm:$0xff]   ;;  %v1821_v27 = vld [vmem:[%s1722_s18 + $0x28] sm:$0xff]   ;;  %v1446_v44 = vld [vmem:[%s1737_s30 + $0x18] sm:$0xff]  ;;  %s1659_s10 = smov 32   ;;  %s1660_s12 = smov 96  }
  0x1b   : > { %1522 = vmatpush3.bf16.msra.mxu1 %v1754_v3  ;;  %1515 = vmatprep.subr.bf16.mxu0 %v1655_v2  ;;  %v432_v26 = vunpack.c.l.bf16 %v1817_v25  ;;  %v435_v29 = vunpack.c.h.bf16 %v1821_v27  ;;  %v436_v39 = vld [vmem:[%s1727_s21] sm:$0xff]  ;;  %v654_v46 = vsub.f32 1.0, %v1446_v44 }
  0x1c   : > { %1523 = vmatprep.subr.bf16.mxu1 %v1655_v2  ;;  %1525 = vmatprep.mubr.msk.bf16.mxu1 %vm1656_vm1, %v1655_v2  ;;  %v642_v41 = vsub.f32 1.0, %v436_v39 }
  0x1d   : > { %571 = vrot.lane.b32.xlu0 %v1455_v8, %s1657_s24  ;;  %1593 = vset.pattern.permute.xlu1 %v1658_v13 }
  0x1e   : > { %v1774_v6 = vld [vmem:[#allocation2] sm:$0xff]  ;;  %v1776_v7 = vld [vmem:[#allocation2 + $0x8] sm:$0xff]  ;;  %1516 = vmatpush3.bf16.msra.mxu0 %v1760_v4  ;;  %1592 = vset.pattern.permute.xlu0 %v1658_v13 }
  0x1f   : > { %v439_v9 = vpack.c.bf16 %v1774_v6, %v1774_v6  ;;  %v496_v10 = vpack.c.bf16 %v1776_v7, %v1776_v7  ;;  %1524 = vmatpush3.bf16.msra.mxu1 %v1769_v5  ;;  %1529 = vmatprep.subr.bf16.mxu0 %v1655_v2 }
  0x20   : > { %1537 = vmatprep.subr.bf16.mxu1 %v1655_v2 }
  0x21   : > { %1518 = vmatmul.mubr.msk.bf16.vlgmr.msra.gmra.mxu0 %vm452_vm2, %v439_v9  ;;  %591 = vrot.lane.b32.xlu0 %v1456_v11, %s1657_s24 }
  0x22   : > { %1526 = vmatmul.mubr.msk.bf16.vlgmr.msra.gmra.mxu1 %vm452_vm2, %v496_v10  ;;  %1530 = vmatpush3.bf16.msra.mxu0 %v1747_v1 }
  0x23   : > { %1538 = vmatpush3.bf16.msra.mxu1 %v1754_v3  ;;  %1531 = vmatprep.subr.bf16.mxu0 %v1655_v2 }
  0x24   : > { %1539 = vmatprep.subr.bf16.mxu1 %v1655_v2  ;;  %1533 = vmatprep.mubr.msk.bf16.mxu0 %vm1656_vm1, %v1655_v2 }
  0x25   : > { %1541 = vmatprep.mubr.msk.bf16.mxu1 %vm1656_vm1, %v1655_v2 }
  0x26   : > { %1532 = vmatpush3.bf16.msra.mxu0 %v1760_v4 }
  0x27   : > { %1540 = vmatpush3.bf16.msra.mxu1 %v1769_v5  ;;  %1545 = vmatprep.subr.bf16.mxu0 %v1655_v2 }
  0x28   : > { %1553 = vmatprep.subr.bf16.mxu1 %v1655_v2 }
  0x8f   : > { %v1808_v12 = vpop.permute.xlu0 %571 }
  0x93   : > { %v1810_v15 = vpop.permute.xlu0 %591 }
  0xe1   : > { %v490_v14 = vpop.f32.mrf.mxu0 }
  0xe2   : > { %v546_v16 = vpop.f32.mrf.mxu1  ;;  %v574_v17 = vadd.f32 %v1808_v12, %v490_v14  ;;  %v552_v28 = vadd.f32 %v490_v14, %v432_v26 }
  0xe3   : > { %v1519_v18 = vpop.f32.mrf.mxu0  ;;  %v594_v20 = vadd.f32 %v1810_v15, %v546_v16  ;;  %v559_v31 = vadd.f32 %v546_v16, %v435_v29 }
  0xe4   : > { %v1527_v19 = vpop.f32.mrf.mxu1  ;;  %576 = vrot.lane.b32.xlu1 %v574_v17, %s1657_s24  ;;  %v1453_v30 = vmul.f32 -1.442695, %v552_v28 }
  0xe5   : > { %v493_v21 = vpop.f32.mrf.mxu0  ;;  %v1454_v32 = vmul.f32 -1.442695, %v559_v31 }
  0xe6   : > { %v549_v22 = vpop.f32.mrf.mxu1  ;;  %1598 = vpow2.f32 %v1453_v30 }
  0xe7   : > { %v1520_v23 = vpop.f32.mrf.mxu0  ;;  %1600 = vpow2.f32 %v1454_v32 }
  0xe8   : > { %v1528_v24 = vpop.f32.mrf.mxu1  ;;  %596 = vrot.lane.b32.xlu1 %v594_v20, %s1657_s24 }
  0xf3   : > { %v1599_v33 = vpop.eup %1598 }
  0xf4   : > { %v556_v34 = vadd.f32 1.0, %v1599_v33  ;;  %v1601_v35 = vpop.eup %1600 }
  0xf5   : > { %v563_v36 = vadd.f32 1.0, %v1601_v35 }
  0xf6   : > { %1602 = vrcp.f32 %v556_v34 }
  0xf7   : > { %1604 = vrcp.f32 %v563_v36  ;;  %v679_v36 = vunpack.c.h.bf16 %v1817_v25 }
 0x103   : > { %v1603_v37 = vpop.eup %1602 }
 0x104   : > { %v1605_v42 = vpop.eup %1604  ;;  %v606_v60 = vsub.f32 1.0, %v1603_v37 }
 0x105   : > { %v618_v9 = vsub.f32 1.0, %v1605_v42 }
 0x156   : > { %v577_v38 = vpop.permute.xlu1 %576 }
 0x157   : > { %v579_v40 = vmul.f32 %v1603_v37, %v577_v38 }
 0x159   : > { %581 = vrot.lane.b32.xlu0 %v579_v40, %s1657_s24 }
 0x15a   : > { %v597_v43 = vpop.permute.xlu1 %596 }
 0x15b   : > { %v599_v45 = vmul.f32 %v1605_v42, %v597_v43 }
 0x15d   : > { %601 = vrot.lane.b32.xlu1 %v599_v45, %s1657_s24  ;;  %645 = vperm.xlu0 %1592, %v642_v41  }
 0x161   : > { %638 = vperm.xlu0 %1592, %v1446_v44   ;;  %657 = vperm.xlu1 %1593, %v654_v46  }
 0x165   : > { %632 = vperm.xlu1 %1593, %v436_v39   ;;  %613 = vrot.lane.b32.xlu0 %v1774_v6, %s1659_s10 }
 0x169   : > { %625 = vrot.lane.b32.xlu0 %v1776_v7, %s1659_s10 }
 0x1cb   : > { %v582_v47 = vpop.permute.xlu0 %581 }
 0x1cc   : > { %v584_v48 = vadd.f32 %v582_v47, %v432_v26 }
 0x1ce   : > { %1606 = vtanh.f32 %v584_v48 }
 0x1cf   : > { %v602_v49 = vpop.permute.xlu1 %601 }
 0x1d0   : > { %v604_v50 = vadd.f32 %v602_v49, %v435_v29 }
 0x1d2   : > { %1608 = vtanh.f32 %v604_v50  ;;  %v1460_v50 = vld [vmem:[%s1727_s21 + $0x8] sm:$0xff] }
 0x1d8   : > { %v646_v55 = vpop.permute.xlu0 %645 }
 0x1d9   : > { %v648_v56 = vmul.f32 %v646_v55, %v1774_v6 }
 0x1db   : > { %v1607_v51 = vpop.eup %1606 }
 0x1dc   : > { %608 = vrot.lane.b32.xlu1 %v1607_v51, %s1660_s12  ;;  %v658_v52 = vpop.permute.xlu1 %657  ;;  %v639_v57 = vpop.permute.xlu0 %638  ;;  %v1461_v51 = vld [vmem:[%s1737_s30 + $0x10] sm:$0xff] }
 0x1dd   : > { %v660_v53 = vmul.f32 %v658_v52, %v1776_v7  ;;  %v847_v52 = vsub.f32 1.0, %v1460_v50 }
 0x1df   : > { %v1609_v54 = vpop.eup %1608  ;;  %662 = vrot.lane.b32.xlu0 %v660_v53, %s1659_s10  ;;  %v855_v53 = vsub.f32 1.0, %v1461_v51 }
 0x1e0   : > { %620 = vrot.lane.b32.xlu1 %v1609_v54, %s1660_s12  ;;  %v614_v58 = vpop.permute.xlu0 %613  ;;  %v633_v59 = vpop.permute.xlu1 %632 }
 0x1e1   : > { %v616_v62 = vmul.f32 %v1603_v37, %v614_v58  ;;  %v682_v37 = vunpack.c.l.bf16 %v1821_v27 }
 0x1e4   : > { %650 = vrot.lane.b32.xlu1 %v648_v56, %s1659_s10  ;;  %v626_v0 = vpop.permute.xlu0 %625 }
 0x1e5   : > { %v628_v7 = vmul.f32 %v1605_v42, %v626_v0 }
 0x24e   : > { %v609_v61 = vpop.permute.xlu1 %608 }
 0x24f   : > { %v611_v63 = vmul.f32 %v609_v61, %v606_v60 }
 0x251   : > { %v617_v8 = vadd.f32 %v616_v62, %v611_v63  ;;  %v663_v16 = vpop.permute.xlu0 %662 }
 0x252   : > { %v621_v10 = vpop.permute.xlu1 %620 }
 0x253   : > { %v623_v11 = vmul.f32 %v621_v10, %v618_v9  ;;  %v1834_v14 = vmul.f32 %v633_v59, %v617_v8 }
 0x255   : > { %v629_v13 = vadd.f32 %v628_v7, %v623_v11 }
 0x256   : > { %v651_v6 = vpop.permute.xlu1 %650 }
 0x257   : > { %v1837_v17 = vadd.f32 %v651_v6, %v1834_v14  ;;  %v1839_v18 = vmul.f32 %v639_v57, %v629_v13 }
 0x259   : > { %v1842_v19 = vadd.f32 %v663_v16, %v1839_v18  ;;  %v687_v20 = vpack.c.bf16 %v1837_v17, %v1837_v17 }
 0x25b   : > { %689 = vrot.lane.b32.xlu1 %v687_v20, %s1660_s12  ;;  %v734_v21 = vpack.c.bf16 %v1842_v19, %v1842_v19 }
 0x25d   : > { %736 = vrot.lane.b32.xlu0 %v734_v21, %s1660_s12 }
 0x2cd   : > { %v690_v22 = vpop.permute.xlu1 %689 }
 0x2ce   : > { %1534 = vmatmul.mubr.msk.bf16.vlgmr.msra.gmra.mxu0 %vm452_vm2, %v690_v22 }
 0x2cf   : > { %v737_v23 = vpop.permute.xlu0 %736  ;;  %1546 = vmatpush3.bf16.msra.mxu0 %v1747_v1  ;;  %1549 = vmatprep.mubr.msk.bf16.mxu0 %vm1656_vm1, %v1655_v2 }
 0x2d0   : > { %1542 = vmatmul.mubr.msk.bf16.vlgmr.msra.gmra.mxu1 %vm452_vm2, %v737_v23  ;;  %1547 = vmatprep.subr.bf16.mxu0 %v1655_v2 }
 0x2d1   : > { %1554 = vmatpush3.bf16.msra.mxu1 %v1754_v3  ;;  %1557 = vmatprep.mubr.msk.bf16.mxu1 %vm1656_vm1, %v1655_v2 }
 0x2d2   : > { %1555 = vmatprep.subr.bf16.mxu1 %v1655_v2 }
 0x2d3   : > { %1548 = vmatpush3.bf16.msra.mxu0 %v1760_v4 }
 0x2d4   : > { %1561 = vmatprep.subr.bf16.mxu0 %v1655_v2 }
 0x2d5   : > { %1556 = vmatpush3.bf16.msra.mxu1 %v1769_v5 }
 0x2d6   : > { %1569 = vmatprep.subr.bf16.mxu1 %v1655_v2 }
 0x38e   : > { %v728_v24 = vpop.f32.mrf.mxu0 }
 0x38f   : > { %v795_v26 = vadd.f32 %v728_v24, %v1808_v12  ;;  %v781_v38 = vadd.f32 %v728_v24, %v679_v36 }
 0x390   : > { %v1535_v28 = vpop.f32.mrf.mxu0  ;;  %v775_v29 = vpop.f32.mrf.mxu1 }
 0x391   : > { %v807_v30 = vadd.f32 %v775_v29, %v1810_v15  ;;  %797 = vrot.lane.b32.xlu1 %v795_v26, %s1657_s24  ;;  %v788_v39 = vadd.f32 %v775_v29, %v682_v37  ;;  %v1464_v40 = vmul.f32 -1.442695, %v781_v38  ;;  %v1913_v38 = vld [vmem:[%s1717_s14 + $0x8] sm:$0xff]  }
 0x392   : > { %v731_v31 = vpop.f32.mrf.mxu0  ;;  %v1543_v32 = vpop.f32.mrf.mxu1 }
 0x393   : > { %809 = vrot.lane.b32.xlu0 %v807_v30, %s1657_s24  ;;  %v1465_v41 = vmul.f32 -1.442695, %v788_v39  ;;  %1610 = vpow2.f32 %v1464_v40 }
 0x394   : > { %v1536_v33 = vpop.f32.mrf.mxu0  ;;  %v778_v34 = vpop.f32.mrf.mxu1 }
 0x395   : > { %1612 = vpow2.f32 %v1465_v41 }
 0x396   : > { %v1544_v35 = vpop.f32.mrf.mxu1 }
 0x3a0   : > { %v1611_v42 = vpop.eup %1610 }
 0x3a1   : > { %v785_v44 = vadd.f32 1.0, %v1611_v42 }
 0x3a2   : > { %v1613_v43 = vpop.eup %1612 }
 0x3a3   : > { %v792_v45 = vadd.f32 1.0, %v1613_v43  ;;  %1614 = vrcp.f32 %v785_v44 }
 0x3a5   : > { %1616 = vrcp.f32 %v792_v45 }
 0x3b0   : > { %v1615_v46 = vpop.eup %1614 }
 0x3b1   : > { %v819_v0 = vsub.f32 1.0, %v1615_v46  ;;  %v825_v9 = vmul.f32 %v1615_v46, %v1837_v17 }
 0x3b2   : > { %v1617_v25 = vpop.eup %1616 }
 0x3b3   : > { %v827_v7 = vsub.f32 1.0, %v1617_v25  ;;  %v833_v6 = vmul.f32 %v1617_v25, %v1842_v19 }
 0x403   : > { %v798_v47 = vpop.permute.xlu1 %797 }
 0x404   : > { %v800_v48 = vmul.f32 %v1615_v46, %v798_v47 }
 0x405   : > { %v810_v49 = vpop.permute.xlu0 %809 }
 0x406   : > { %v812_v27 = vmul.f32 %v1617_v25, %v810_v49  ;;  %802 = vrot.lane.b32.xlu1 %v800_v48, %s1657_s24 }
 0x408   : > { %814 = vrot.lane.b32.xlu0 %v812_v27, %s1657_s24 }
 0x40a   : > { %837 = vperm.xlu1 %1593, %v1460_v50  }
 0x40c   : > { %843 = vperm.xlu0 %1592, %v1461_v51  }
 0x40e   : > { %850 = vperm.xlu1 %1593, %v847_v52   ;;  %v1470_v52 = vld [vmem:[%s1727_s21 + $0x10] sm:$0xff] }
 0x410   : > { %858 = vperm.xlu0 %1592, %v855_v53   ;;  %v1471_v53 = vld [vmem:[%s1737_s30 + $0x8] sm:$0xff] }
 0x478   : > { %v803_v54 = vpop.permute.xlu1 %802 }
 0x479   : > { %v805_v55 = vadd.f32 %v803_v54, %v679_v36  ;;  %v1045_v54 = vsub.f32 1.0, %v1470_v52 }
 0x47a   : > { %v815_v56 = vpop.permute.xlu0 %814 }
 0x47b   : > { %1618 = vtanh.f32 %v805_v55  ;;  %v817_v57 = vadd.f32 %v815_v56, %v682_v37  ;;  %v1053_v55 = vsub.f32 1.0, %v1471_v53 }
 0x47d   : > { %1620 = vtanh.f32 %v817_v57 }
 0x485   : > { %v838_v60 = vpop.permute.xlu1 %837 }
 0x487   : > { %v844_v61 = vpop.permute.xlu0 %843 }
 0x488   : > { %v1619_v58 = vpop.eup %1618 }
 0x489   : > { %821 = vrot.lane.b32.xlu1 %v1619_v58, %s1660_s12  ;;  %v851_v62 = vpop.permute.xlu1 %850 }
 0x48a   : > { %v1621_v59 = vpop.eup %1620  ;;  %v853_v20 = vmul.f32 %v851_v62, %v1837_v17 }
 0x48b   : > { %829 = vrot.lane.b32.xlu0 %v1621_v59, %s1660_s12  ;;  %v859_v63 = vpop.permute.xlu0 %858 }
 0x48c   : > { %v861_v23 = vmul.f32 %v859_v63, %v1842_v19 }
 0x4fb   : > { %v822_v8 = vpop.permute.xlu1 %821 }
 0x4fc   : > { %v824_v10 = vmul.f32 %v822_v8, %v819_v0 }
 0x4fd   : > { %v830_v11 = vpop.permute.xlu0 %829 }
 0x4fe   : > { %v826_v13 = vadd.f32 %v825_v9, %v824_v10  ;;  %v832_v16 = vmul.f32 %v830_v11, %v827_v7 }
 0x500   : > { %v1879_v21 = vmul.f32 %v838_v60, %v826_v13  ;;  %v834_v22 = vadd.f32 %v833_v6, %v832_v16 }
 0x502   : > { %v1883_v24 = vadd.f32 %v853_v20, %v1879_v21  ;;  %v1885_v26 = vmul.f32 %v844_v61, %v834_v22 }
 0x504   : > { %v1888_v28 = vadd.f32 %v861_v23, %v1885_v26  ;;  %v885_v29 = vpack.c.bf16 %v1883_v24, %v1883_v24 }
 0x506   : > { %887 = vrot.lane.b32.xlu1 %v885_v29, %s1660_s12  ;;  %v932_v17 = vpack.c.bf16 %v1888_v28, %v1888_v28 }
 0x508   : > { %934 = vrot.lane.b32.xlu0 %v932_v17, %s1660_s12 }
 0x578   : > { %v888_v30 = vpop.permute.xlu1 %887 }
 0x579   : > { %1550 = vmatmul.mubr.msk.bf16.vlgmr.msra.gmra.mxu0 %vm452_vm2, %v888_v30 }
 0x57a   : > { %v935_v19 = vpop.permute.xlu0 %934  ;;  %1562 = vmatpush3.bf16.msra.mxu0 %v1747_v1  ;;  %1565 = vmatprep.mubr.msk.bf16.mxu0 %vm1656_vm1, %v1655_v2 }
 0x57b   : > { %1558 = vmatmul.mubr.msk.bf16.vlgmr.msra.gmra.mxu1 %vm452_vm2, %v935_v19  ;;  %1563 = vmatprep.subr.bf16.mxu0 %v1655_v2 }
 0x57c   : > { %1570 = vmatpush3.bf16.msra.mxu1 %v1754_v3  ;;  %1573 = vmatprep.mubr.msk.bf16.mxu1 %vm1656_vm1, %v1655_v2 }
 0x57d   : > { %1571 = vmatprep.subr.bf16.mxu1 %v1655_v2 }
 0x57e   : > { %1564 = vmatpush3.bf16.msra.mxu0 %v1760_v4  ;;  %v1916_v4 = vld [vmem:[%s1722_s18 + $0x20] sm:$0xff]  }
 0x57f   : > { %v880_v39 = vunpack.c.h.bf16 %v1916_v4 }
 0x580   : > { %1572 = vmatpush3.bf16.msra.mxu1 %v1769_v5  ;;  %v877_v5 = vunpack.c.l.bf16 %v1913_v38 }
 0x639   : > { %v926_v1 = vpop.f32.mrf.mxu0 }
 0x63a   : > { %v993_v31 = vadd.f32 %v926_v1, %v1808_v12  ;;  %v979_v40 = vadd.f32 %v926_v1, %v877_v5 }
 0x63b   : > { %v1551_v32 = vpop.f32.mrf.mxu0  ;;  %v973_v33 = vpop.f32.mrf.mxu1 }
 0x63c   : > { %v1005_v34 = vadd.f32 %v973_v33, %v1810_v15  ;;  %995 = vrot.lane.b32.xlu1 %v993_v31, %s1657_s24  ;;  %v986_v41 = vadd.f32 %v973_v33, %v880_v39  ;;  %v1474_v42 = vmul.f32 -1.442695, %v979_v40 }
 0x63d   : > { %v929_v3 = vpop.f32.mrf.mxu0  ;;  %v1559_v35 = vpop.f32.mrf.mxu1 }
 0x63e   : > { %1007 = vrot.lane.b32.xlu0 %v1005_v34, %s1657_s24  ;;  %v1475_v43 = vmul.f32 -1.442695, %v986_v41  ;;  %1622 = vpow2.f32 %v1474_v42  ;;  %v1075_v42 = vunpack.c.h.bf16 %v1913_v38 }
 0x63f   : > { %v1552_v36 = vpop.f32.mrf.mxu0  ;;  %v976_v2 = vpop.f32.mrf.mxu1 }
 0x640   : > { %1624 = vpow2.f32 %v1475_v43  ;;  %v1077_v43 = vunpack.c.l.bf16 %v1916_v4 }
 0x641   : > { %v1560_v37 = vpop.f32.mrf.mxu1 }
 0x64b   : > { %v1623_v44 = vpop.eup %1622 }
 0x64c   : > { %v983_v46 = vadd.f32 1.0, %v1623_v44 }
 0x64d   : > { %v1625_v45 = vpop.eup %1624 }
 0x64e   : > { %v990_v47 = vadd.f32 1.0, %v1625_v45  ;;  %1626 = vrcp.f32 %v983_v46 }
 0x650   : > { %1628 = vrcp.f32 %v990_v47 }
 0x65b   : > { %v1627_v48 = vpop.eup %1626 }
 0x65c   : > { %v1017_v9 = vsub.f32 1.0, %v1627_v48  ;;  %v1023_v7 = vmul.f32 %v1627_v48, %v1883_v24 }
 0x65d   : > { %v1629_v27 = vpop.eup %1628 }
 0x65e   : > { %v1025_v13 = vsub.f32 1.0, %v1629_v27  ;;  %v1031_v20 = vmul.f32 %v1629_v27, %v1888_v28 }
 0x6ae   : > { %v996_v25 = vpop.permute.xlu1 %995 }
 0x6af   : > { %v998_v49 = vmul.f32 %v1627_v48, %v996_v25 }
 0x6b0   : > { %v1008_v50 = vpop.permute.xlu0 %1007 }
 0x6b1   : > { %v1010_v51 = vmul.f32 %v1629_v27, %v1008_v50  ;;  %1000 = vrot.lane.b32.xlu1 %v998_v49, %s1657_s24 }
 0x6b3   : > { %1012 = vrot.lane.b32.xlu0 %v1010_v51, %s1657_s24 }
 0x6b5   : > { %1035 = vperm.xlu1 %1593, %v1470_v52   ;;  %v1480_v52 = vld [vmem:[%s1727_s21 + $0x18] sm:$0xff] }
 0x6b7   : > { %1041 = vperm.xlu0 %1592, %v1471_v53   ;;  %v1080_v53 = vld [vmem:[%s1737_s30] sm:$0xff] }
 0x6b9   : > { %1048 = vperm.xlu1 %1593, %v1045_v54   ;;  %v1241_v54 = vsub.f32 1.0, %v1480_v52 }
 0x6bb   : > { %1056 = vperm.xlu0 %1592, %v1053_v55   ;;  %v1249_v55 = vsub.f32 1.0, %v1080_v53 }
 0x723   : > { %v1001_v56 = vpop.permute.xlu1 %1000 }
 0x724   : > { %v1003_v57 = vadd.f32 %v1001_v56, %v877_v5 }
 0x725   : > { %v1013_v58 = vpop.permute.xlu0 %1012 }
 0x726   : > { %1630 = vtanh.f32 %v1003_v57  ;;  %v1015_v59 = vadd.f32 %v1013_v58, %v880_v39 }
 0x728   : > { %1632 = vtanh.f32 %v1015_v59 }
 0x730   : > { %v1036_v62 = vpop.permute.xlu1 %1035 }
 0x732   : > { %v1042_v63 = vpop.permute.xlu0 %1041 }
 0x733   : > { %v1631_v60 = vpop.eup %1630 }
 0x734   : > { %1019 = vrot.lane.b32.xlu1 %v1631_v60, %s1660_s12  ;;  %v1049_v0 = vpop.permute.xlu1 %1048 }
 0x735   : > { %v1633_v61 = vpop.eup %1632  ;;  %v1051_v23 = vmul.f32 %v1049_v0, %v1883_v24 }
 0x736   : > { %1027 = vrot.lane.b32.xlu0 %v1633_v61, %s1660_s12  ;;  %v1057_v8 = vpop.permute.xlu0 %1056 }
 0x737   : > { %v1059_v30 = vmul.f32 %v1057_v8, %v1888_v28 }
 0x7a6   : > { %v1020_v10 = vpop.permute.xlu1 %1019 }
 0x7a7   : > { %v1022_v11 = vmul.f32 %v1020_v10, %v1017_v9 }
 0x7a8   : > { %v1028_v6 = vpop.permute.xlu0 %1027 }
 0x7a9   : > { %v1024_v16 = vadd.f32 %v1023_v7, %v1022_v11  ;;  %v1030_v22 = vmul.f32 %v1028_v6, %v1025_v13 }
 0x7ab   : > { %v1929_v29 = vmul.f32 %v1036_v62, %v1024_v16  ;;  %v1032_v17 = vadd.f32 %v1031_v20, %v1030_v22 }
 0x7ad   : > { %v1933_v19 = vadd.f32 %v1051_v23, %v1929_v29  ;;  %v1935_v1 = vmul.f32 %v1042_v63, %v1032_v17 }
 0x7af   : > { %v1938_v31 = vadd.f32 %v1059_v30, %v1935_v1  ;;  %v1081_v32 = vpack.c.bf16 %v1933_v19, %v1933_v19 }
 0x7b1   : > { %1083 = vrot.lane.b32.xlu1 %v1081_v32, %s1660_s12  ;;  %v1128_v24 = vpack.c.bf16 %v1938_v31, %v1938_v31 }
 0x7b3   : > { %1130 = vrot.lane.b32.xlu0 %v1128_v24, %s1660_s12 }
 0x823   : > { %v1084_v33 = vpop.permute.xlu1 %1083 }
 0x824   : > { %1566 = vmatmul.mubr.msk.bf16.vlgmr.msra.gmra.mxu0 %vm452_vm2, %v1084_v33 }
 0x825   : > { %v1131_v28 = vpop.permute.xlu0 %1130 }
 0x826   : > { %1574 = vmatmul.mubr.msk.bf16.vlgmr.msra.gmra.mxu1 %vm452_vm2, %v1131_v28 }
 0x8e4   : > { %v1122_v34 = vpop.f32.mrf.mxu0 }
 0x8e5   : > { %v1189_v3 = vadd.f32 %v1122_v34, %v1808_v12  ;;  %v1175_v44 = vadd.f32 %v1122_v34, %v1075_v42 }
 0x8e6   : > { %v1567_v35 = vpop.f32.mrf.mxu0  ;;  %v1169_v36 = vpop.f32.mrf.mxu1 }
 0x8e7   : > { %v1201_v2 = vadd.f32 %v1169_v36, %v1810_v15  ;;  %1191 = vrot.lane.b32.xlu1 %v1189_v3, %s1657_s24  ;;  %v1182_v45 = vadd.f32 %v1169_v36, %v1077_v43  ;;  %v1483_v12 = vmul.f32 -1.442695, %v1175_v44 }
 0x8e8   : > { %v1125_v37 = vpop.f32.mrf.mxu0  ;;  %v1575_v5 = vpop.f32.mrf.mxu1 }
 0x8e9   : > { %1203 = vrot.lane.b32.xlu0 %v1201_v2, %s1657_s24  ;;  %v1484_v46 = vmul.f32 -1.442695, %v1182_v45  ;;  %1634 = vpow2.f32 %v1483_v12 }
 0x8ea   : > { %v1568_v39 = vpop.f32.mrf.mxu0  ;;  %v1172_v40 = vpop.f32.mrf.mxu1 }
 0x8eb   : > { %1636 = vpow2.f32 %v1484_v46 }
 0x8ec   : > { %v1576_v41 = vpop.f32.mrf.mxu1 }
 0x8f6   : > { %v1635_v15 = vpop.eup %1634 }
 0x8f7   : > { %v1179_v48 = vadd.f32 1.0, %v1635_v15 }
 0x8f8   : > { %v1637_v47 = vpop.eup %1636 }
 0x8f9   : > { %v1186_v25 = vadd.f32 1.0, %v1637_v47  ;;  %1638 = vrcp.f32 %v1179_v48 }
 0x8fb   : > { %1640 = vrcp.f32 %v1186_v25 }
 0x906   : > { %v1639_v49 = vpop.eup %1638 }
 0x907   : > { %v1213_v8 = vsub.f32 1.0, %v1639_v49  ;;  %v1219_v9 = vmul.f32 %v1639_v49, %v1933_v19 }
 0x908   : > { %v1641_v38 = vpop.eup %1640 }
 0x909   : > { %v1221_v10 = vsub.f32 1.0, %v1641_v38  ;;  %v1227_v11 = vmul.f32 %v1641_v38, %v1938_v31 }
 0x959   : > { %v1192_v27 = vpop.permute.xlu1 %1191 }
 0x95a   : > { %v1194_v50 = vmul.f32 %v1639_v49, %v1192_v27 }
 0x95b   : > { %v1204_v51 = vpop.permute.xlu0 %1203 }
 0x95c   : > { %v1206_v4 = vmul.f32 %v1641_v38, %v1204_v51  ;;  %1196 = vrot.lane.b32.xlu1 %v1194_v50, %s1657_s24 }
 0x95e   : > { %1208 = vrot.lane.b32.xlu0 %v1206_v4, %s1657_s24 }
 0x960   : > { %1231 = vperm.xlu1 %1593, %v1480_v52  }
 0x962   : > { %1237 = vperm.xlu0 %1592, %v1080_v53  }
 0x964   : > { %1244 = vperm.xlu1 %1593, %v1241_v54  }
 0x966   : > { %1252 = vperm.xlu0 %1592, %v1249_v55  }
 0x9ce   : > { %v1197_v56 = vpop.permute.xlu1 %1196 }
 0x9cf   : > { %v1199_v57 = vadd.f32 %v1197_v56, %v1075_v42 }
 0x9d0   : > { %v1209_v58 = vpop.permute.xlu0 %1208 }
 0x9d1   : > { %1642 = vtanh.f32 %v1199_v57  ;;  %v1211_v59 = vadd.f32 %v1209_v58, %v1077_v43 }
 0x9d3   : > { %1644 = vtanh.f32 %v1211_v59 }
 0x9db   : > { %v1232_v62 = vpop.permute.xlu1 %1231 }
 0x9dd   : > { %v1238_v63 = vpop.permute.xlu0 %1237 }
 0x9de   : > { %v1643_v60 = vpop.eup %1642 }
 0x9df   : > { %1215 = vrot.lane.b32.xlu1 %v1643_v60, %s1660_s12  ;;  %v1245_v0 = vpop.permute.xlu1 %1244 }
 0x9e0   : > { %v1645_v61 = vpop.eup %1644  ;;  %v1247_v23 = vmul.f32 %v1245_v0, %v1933_v19 }
 0x9e1   : > { %1223 = vrot.lane.b32.xlu0 %v1645_v61, %s1660_s12 }
 0x9e3   : > { %667 = vrot.lane.b32.xlu1 %v1834_v14, %s1660_s12  ;;  %v1253_v14 = vpop.permute.xlu0 %1252 }
 0x9e4   : > { %v1255_v30 = vmul.f32 %v1253_v14, %v1938_v31 }
 0x9e5   : > { %672 = vrot.lane.b32.xlu0 %v1839_v18, %s1660_s12 }
 0x9e7   : > { %864 = vrot.lane.b32.xlu1 %v1879_v21, %s1660_s12 }
 0x9e9   : > { %870 = vrot.lane.b32.xlu0 %v1885_v26, %s1660_s12 }
 0x9eb   : > { %1062 = vrot.lane.b32.xlu1 %v1929_v29, %s1660_s12 }
 0x9ed   : > { %1068 = vrot.lane.b32.xlu0 %v1935_v1, %s1660_s12 }
 0xa51   : > { %v1216_v18 = vpop.permute.xlu1 %1215 }
 0xa52   : > { %v1218_v21 = vmul.f32 %v1216_v18, %v1213_v8 }
 0xa53   : > { %v1224_v26 = vpop.permute.xlu0 %1223 }
 0xa54   : > { %v1220_v7 = vadd.f32 %v1219_v9, %v1218_v21  ;;  %v1226_v13 = vmul.f32 %v1224_v26, %v1221_v10 }
 0xa55   : > { %v668_v6 = vpop.permute.xlu1 %667 }
 0xa56   : > { %v1228_v16 = vadd.f32 %v1227_v11, %v1226_v13  ;;  %670 = vst.msk [vmem:[%s1732_s25] sm:$0xff] %vm452_vm2, %v668_v6  ;;  %v1234_v20 = vmul.f32 %v1232_v62, %v1220_v7 }
 0xa57   : > { %v673_v22 = vpop.permute.xlu0 %672 }
 0xa58   : > { %1457 = vst.msk [vmem:[%s1742_s13 + $0x18] sm:$0xff] %vm452_vm2, %v673_v22  ;;  %1258 = vrot.lane.b32.xlu1 %v1234_v20, %s1660_s12  ;;  %v1240_v29 = vmul.f32 %v1238_v63, %v1228_v16  ;;  %v1248_v1 = vadd.f32 %v1247_v23, %v1234_v20 }
 0xa59   : > { %v865_v17 = vpop.permute.xlu1 %864 }
 0xa5a   : > { %1466 = vst.msk [vmem:[%s1732_s25 + $0x8] sm:$0xff] %vm452_vm2, %v865_v17  ;;  %1264 = vrot.lane.b32.xlu0 %v1240_v29, %s1660_s12  ;;  %v1256_v19 = vadd.f32 %v1255_v30, %v1240_v29 }
 0xa5b   : > { %v871_v32 = vpop.permute.xlu0 %870 }
 0xa5c   : > { %1467 = vst.msk [vmem:[%s1742_s13 + $0x10] sm:$0xff] %vm452_vm2, %v871_v32  ;;  %1269 = vrot.lane.b32.xlu1 %v1248_v1, %s1660_s12 }
 0xa5d   : > { %v1063_v24 = vpop.permute.xlu1 %1062 }
 0xa5e   : > { %1476 = vst.msk [vmem:[%s1732_s25 + $0x10] sm:$0xff] %vm452_vm2, %v1063_v24  ;;  %1274 = vrot.lane.b32.xlu0 %v1256_v19, %s1660_s12 }
 0xa5f   : > { %v1069_v33 = vpop.permute.xlu0 %1068 }
 0xa60   : > { %1477 = vst.msk [vmem:[%s1742_s13 + $0x8] sm:$0xff] %vm452_vm2, %v1069_v33 }
 0xaca   : > { %v1259_v31 = vpop.permute.xlu1 %1258 }
 0xacb   : > { %1485 = vst.msk [vmem:[%s1732_s25 + $0x18] sm:$0xff] %vm452_vm2, %v1259_v31 }
 0xacc   : > { %v1265_v28 = vpop.permute.xlu0 %1264 }
 0xacd   : > { %1267 = vst.msk [vmem:[%s1742_s13] sm:$0xff] %vm452_vm2, %v1265_v28 }
 0xace   : > { %v1270_v34 = vpop.permute.xlu1 %1269 }
 0xacf   : > { %1272 = vst.msk [vmem:[#allocation2] sm:$0xff] %vm452_vm2, %v1270_v34  ;;  %1278 = vst.msk [vmem:[%s2017_s8] sm:$0xff] %vm452_vm2, %v1270_v34 }
 0xad0   : > { %v1275_v3 = vpop.permute.xlu0 %1274 }
 0xad1   : > { %1277 = vst.msk [vmem:[#allocation2 + $0x8] sm:$0xff] %vm452_vm2, %v1275_v3  ;;  %1486 = vst.msk [vmem:[%s2017_s8 + $0x8] sm:$0xff] %vm452_vm2, %v1275_v3 }
 0xad2 PF: > { %s19_s27 = sadd.s32 1, %s1652_s27  }
 0xad3   : > { %p16_p6 = scmp.ge.s32.totalorder %s19_s27, 4  }
 0xad5   :  { %18 = sbr.rel (!%p16_p6) target bundleno = 1 (0x1), region = 129 }

</bundles_post_ra>
